<compile_context>
chip_gen: v6e
topology: v6e:2x2x1
jax: 0.10.0
libtpu: 0.0.40
codegen_flags: <defaults>
</compile_context>

<pallas_src>
import math

import jax
import jax.numpy as jnp
from jax import lax
from jax.experimental import pallas as pl
from jax.experimental.pallas import tpu as pltpu


def light_attention_kernel(x_ref, w_ref, b_ref, out_ref, xp_ref):
    # x_ref:   [1, L, D_in]        compute dtype (bf16)
    # w_ref:   [K, D_in, 2*TD]     fused (feature | attention) conv taps (bf16)
    # b_ref:   [1, 2*TD]           fused conv bias, f32
    # out_ref: [1, L, TD]
    # xp_ref:  [L + K - 1, D_in]   compute-dtype zero-padded sequence scratch
    L = x_ref.shape[1]
    d_in = x_ref.shape[2]
    K = w_ref.shape[0]
    td = out_ref.shape[2]
    pad = K // 2

    # Stage the zero-padded sequence into VMEM in the compute dtype: no HBM-side
    # pad, no f32 round-trip, no per-tap down-casts.
    xp_ref[0:pad, :] = jnp.zeros((pad, d_in), xp_ref.dtype)
    xp_ref[L + pad:L + 2 * pad, :] = jnp.zeros((pad, d_in), xp_ref.dtype)
    xp_ref[pad:pad + L, :] = x_ref[0]

    # Both convolutions at once: each tap is one [L, D_in] @ [D_in, 2*TD] MXU
    # matmul with f32 accumulation (9 matmuls instead of 18).  The accumulator
    # starts from the broadcast bias, removing a separate [L, 2*TD] VPU add.
    acc = jnp.broadcast_to(b_ref[...], (L, 2 * td)).astype(jnp.float32)
    for k in range(K):  # static unroll (K = 9): keeps the MXU fed, LLO-visible
        # TODO(synk): check the bundle dump for relayout copies from the
        # unaligned sublane offset k; restructure to aligned loads only if they
        # actually materialize (they may already lower to cheap masked loads).
        acc = acc + jnp.dot(xp_ref[k:k + L, :], w_ref[k],
                            preferred_element_type=jnp.float32)

    feat = acc[:, :td]
    attn = acc[:, td:]

    # softmax over the sequence axis (== PyTorch softmax(dim=-1) on [B, D, L]),
    # exact per output channel, so channel tiling does not change the result.
    m = jnp.max(attn, axis=0, keepdims=True)
    e = jnp.exp(attn - m)
    s = jnp.sum(e, axis=0, keepdims=True)
    # Exact reciprocal: the operand is only [1, TD] (post-reduction), so it is
    # off the critical path; avoids the ~1e-3 error of the approximate EUP rcp.
    soft = e * pl.reciprocal(s, approx=False)

    # TODO(synk): conv_dropout (nn.Dropout) is identity here (inference / eval);
    # the mask argument is unused by the provided PyTorch forward as well.
    out_ref[0] = (feat * soft).astype(out_ref.dtype)


def _vmem_capacity_bytes():
    """Physical VMEM of the local TPU generation; conservative fallback."""
    try:
        info = pltpu.get_tpu_info()
        for attr in ("vmem_capacity_bytes", "vmem_size_bytes", "vmem_bytes"):
            v = getattr(info, attr, None)
            if v:
                return int(v)
    except Exception:
        pass
    return 64 * 1024 * 1024  # assume the smallest (v7x) if the query fails


def light_attention(x, mask, wf, bf, wa, ba, kernel_size=9,
                    compute_dtype=jnp.bfloat16):
    """x: [B, L, D]; mask unused (API parity with the PyTorch forward).

    wf, wa: [D_out, D_in, K] PyTorch Conv1d weights; bf, ba: [D_out] biases.
    Returns [B, L, D] in x.dtype.
    """
    del mask  # the provided forward never uses it (no masked_fill in this variant)
    B, L, D = x.shape
    K = kernel_size
    pad = K // 2
    Lp = L + 2 * pad

    cdt_size = jnp.dtype(compute_dtype).itemsize
    out_size = jnp.dtype(x.dtype).itemsize

    vmem_cap = _vmem_capacity_bytes()
    vmem_budget = (3 * vmem_cap) // 4  # ~48 MiB on v7x, ~96 MiB on v5e/v6e

    def vmem_need(td_):
        # single-buffered fused weights + double-buffered x / out blocks +
        # compute-dtype staging scratch + live f32 accumulator (+ bias).
        return (K * D * 2 * td_ * cdt_size
                + 2 * L * D * cdt_size
                + 2 * L * td_ * out_size
                + Lp * D * cdt_size
                + L * 2 * td_ * 4
                + 2 * 2 * td_ * 4)

    # Output-channel tile selection, generation-aware:
    #   * v5e / v6e (128 MiB VMEM, 1 TensorCore): make td as large as fits; x's
    #     block is re-read from HBM once per channel tile, so nd == 1 removes
    #     the redundant x traffic and the repeated staging copy.
    #   * v7x (64 MiB VMEM, 2 TensorCores): keep nd >= 2 so the "parallel"
    #     channel axis can shard across both cores.
    if D % 128 != 0:
        td = D  # small-D fallback (unit-test shapes); lane-sparse but tiny
    else:
        cands = sorted({c for c in (D, 1024, 512, 256, 128) if D % c == 0},
                       reverse=True)
        if vmem_cap < 100 * 1024 * 1024 and D >= 256:  # v7x-class chip
            multi = [c for c in cands if D // c >= 2]
            cands = multi or cands
        td = next((c for c in cands if vmem_need(c) <= vmem_budget), cands[-1])
    nd = D // td

    vmem_limit = vmem_budget
    if vmem_need(td) > vmem_limit:
        vmem_limit = min(int(vmem_need(td) + (8 << 20)), int(vmem_cap * 0.9))

    # In a real model these casts fuse into the producing ops / are done once.
    x_c = x.astype(compute_dtype)

    # PyTorch Conv1d weight is [D_out, D_in, K]; rearrange to a contiguous
    # per-channel-tile slab [nd, K, D_in, 2*td] (feature | attention interleaved
    # per tile) so each weight block is one large linear DMA.
    wf_t = jnp.transpose(wf, (2, 1, 0)).reshape(K, D, nd, td)
    wa_t = jnp.transpose(wa, (2, 1, 0)).reshape(K, D, nd, td)
    w_fused = jnp.concatenate([wf_t, wa_t], axis=-1)            # [K, D, nd, 2td]
    w_fused = jnp.transpose(w_fused, (2, 0, 1, 3)).astype(compute_dtype)

    b_fused = jnp.concatenate(
        [bf.reshape(nd, td), ba.reshape(nd, td)], axis=-1
    ).reshape(1, nd * 2 * td).astype(jnp.float32)

    bytes_in = (nd * x_c.size * x_c.dtype.itemsize
                + w_fused.size * w_fused.dtype.itemsize
                + b_fused.size * b_fused.dtype.itemsize)
    bytes_out = B * L * D * x.dtype.itemsize
    cost = pl.CostEstimate(
        flops=4 * K * L * D * D * B,          # 2 convs x 2 flops per MAC
        transcendentals=B * L * D,            # softmax exp
        bytes_accessed=int(bytes_in + bytes_out),
    )

    def build(weight_pipeline_mode):
        if weight_pipeline_mode is None:
            w_spec = pl.BlockSpec((pl.Squeezed(), K, D, 2 * td),
                                  lambda d, b: (d, 0, 0, 0))
        else:
            w_spec = pl.BlockSpec((pl.Squeezed(), K, D, 2 * td),
                                  lambda d, b: (d, 0, 0, 0),
                                  pipeline_mode=weight_pipeline_mode)
        return pl.pallas_call(
            light_attention_kernel,
            out_shape=jax.ShapeDtypeStruct((B, L, D), x.dtype),
            grid_spec=pltpu.PrefetchScalarGridSpec(
                num_scalar_prefetch=0,
                # Channel tiles outer (weight block stays resident across the
                # inner batch axis), batch inner.  Both independent -> parallel.
                grid=(nd, B),
                in_specs=[
                    pl.BlockSpec((1, L, D), lambda d, b: (b, 0, 0)),     # x
                    w_spec,                                              # fused W
                    pl.BlockSpec((1, 2 * td), lambda d, b: (0, d)),      # fused bias
                ],
                out_specs=pl.BlockSpec((1, L, td), lambda d, b: (b, 0, d)),
                scratch_shapes=[pltpu.VMEM((Lp, D), compute_dtype)],
            ),
            compiler_params=pltpu.CompilerParams(
                dimension_semantics=("parallel", "parallel"),
                vmem_limit_bytes=int(vmem_limit),
            ),
            cost_estimate=cost,
        )

    try:
        # The weight block only changes on the outer grid axis (once every B
        # inner steps), so single-buffering it frees ~half the weight VMEM
        # (important on v7x's 64 MiB); the occasional un-overlapped weight DMA
        # is amortized over B compute steps.
        out = build(pl.Buffered(1))(x_c, w_fused, b_fused)
        return jax.block_until_ready(out)
    except Exception:
        # Fallback: default double-buffering if single-buffering is unsupported.
        return build(None)(x_c, w_fused, b_fused)


def light_attention_reference(x, wf, bf, wa, ba, kernel_size=9):
    """Pure-JAX f32 reference mirroring the PyTorch forward."""
    pad = kernel_size // 2
    xt = jnp.transpose(x, (0, 2, 1))  # [B, D, L] (NCL), matches x.transpose(1, 2)
    dn = ("NCH", "OIH", "NCH")
    o = lax.conv_general_dilated(xt, wf, (1,), [(pad, pad)],
                                 dimension_numbers=dn) + bf[None, :, None]
    a = lax.conv_general_dilated(xt, wa, (1,), [(pad, pad)],
                                 dimension_numbers=dn) + ba[None, :, None]
    soft = jax.nn.softmax(a, axis=-1)
    return jnp.transpose(o * soft, (0, 2, 1))


if __name__ == "__main__":
    K = 9
    shapes = [
        (2, 16, 32),    # tiny sanity shape (single channel tile, lane-sparse)
        (2, 16, 256),   # exercises the multiple-of-128 channel-tiling path
    ]
    for (B, L, D) in shapes:
        key = jax.random.PRNGKey(0)
        kx, kwf, kbf, kwa, kba = jax.random.split(key, 5)

        x = jax.random.normal(kx, (B, L, D), dtype=jnp.float32)
        mask = jnp.ones((B, L), dtype=bool)  # API parity with PyTorch; unused

        # Deterministic Conv1d-style init: U(-1/sqrt(fan_in), 1/sqrt(fan_in)).
        bound = 1.0 / math.sqrt(D * K)
        wf = jax.random.uniform(kwf, (D, D, K), jnp.float32, -bound, bound)
        bf = jax.random.uniform(kbf, (D,), jnp.float32, -bound, bound)
        wa = jax.random.uniform(kwa, (D, D, K), jnp.float32, -bound, bound)
        ba = jax.random.uniform(kba, (D,), jnp.float32, -bound, bound)

        out = jax.block_until_ready(
            light_attention(x, mask, wf, bf, wa, ba, kernel_size=K))
        ref = jax.block_until_ready(
            light_attention_reference(x, wf, bf, wa, ba, kernel_size=K))

        assert out.shape == (B, L, D), out.shape
        err = float(jnp.max(jnp.abs(out - ref)))
        assert jnp.allclose(out, ref, atol=2e-2, rtol=2e-2), err

    print("KERNEL_OK")
</pallas_src>

<mosaic_0001>
module attributes {stable_mosaic.version = 11 : i64} {
  func.func @light_attention_kernel(%arg0: i32, %arg1: i32, %arg2: memref<1x16x32xbf16, #tpu.memory_space<vmem>>, %arg3: memref<1x9x32x64xbf16, #tpu.memory_space<vmem>>, %arg4: memref<1x64xf32, #tpu.memory_space<vmem>>, %arg5: memref<1x16x32xf32, #tpu.memory_space<vmem>>, %arg6: memref<24x32xbf16, #tpu.memory_space<vmem>>) attributes {dimension_semantics = [#tpu.dimension_semantics<parallel>, #tpu.dimension_semantics<parallel>], iteration_bounds = array<i64: 1, 2>, scalar_prefetch = 0 : i64, scratch_operands = 1 : i64, tpu.core_type = #tpu.core_type<tc>, window_params = [{transform_indices = @transform_0, window_bounds = array<i64: 1, 16, 32>}, {pipeline_mode = #tpu.pipeline_mode<synchronous>, transform_indices = @transform_1, window_bounds = array<i64: 1, 9, 32, 64>}, {transform_indices = @transform_2, window_bounds = array<i64: 1, 64>}, {transform_indices = @transform_3, window_bounds = array<i64: 1, 16, 32>}]} {
    %cst = arith.constant 0.000000e+00 : bf16
    %0 = vector.broadcast %cst : bf16 to vector<4x32xbf16>
    %c0 = arith.constant 0 : index
    %c0_0 = arith.constant 0 : index
    %1 = vector.load %arg6[%c0, %c0_0] : memref<24x32xbf16, #tpu.memory_space<vmem>>, vector<4x32xbf16>
    tpu.vector_store %arg6[%c0, %c0_0], %0 {strides = array<i32>} : memref<24x32xbf16, #tpu.memory_space<vmem>>, vector<4x32xbf16>,
    %cst_1 = arith.constant 0.000000e+00 : bf16
    %2 = vector.broadcast %cst_1 : bf16 to vector<4x32xbf16>
    %c20 = arith.constant 20 : index
    %c0_2 = arith.constant 0 : index
    %3 = vector.load %arg6[%c20, %c0_2] : memref<24x32xbf16, #tpu.memory_space<vmem>>, vector<4x32xbf16>
    tpu.vector_store %arg6[%c20, %c0_2], %2 {strides = array<i32>} : memref<24x32xbf16, #tpu.memory_space<vmem>>, vector<4x32xbf16>,
    %c0_3 = arith.constant 0 : index
    %c0_4 = arith.constant 0 : index
    %c0_5 = arith.constant 0 : index
    %4 = vector.load %arg2[%c0_3, %c0_4, %c0_5] : memref<1x16x32xbf16, #tpu.memory_space<vmem>>, vector<1x16x32xbf16>
    %5 = vector.shape_cast %4 : vector<1x16x32xbf16> to vector<16x32xbf16>
    %c4 = arith.constant 4 : index
    %c0_6 = arith.constant 0 : index
    %6 = vector.load %arg6[%c4, %c0_6] : memref<24x32xbf16, #tpu.memory_space<vmem>>, vector<16x32xbf16>
    tpu.vector_store %arg6[%c4, %c0_6], %5 {strides = array<i32>} : memref<24x32xbf16, #tpu.memory_space<vmem>>, vector<16x32xbf16>,
    %c0_7 = arith.constant 0 : index
    %c0_8 = arith.constant 0 : index
    %7 = vector.load %arg4[%c0_7, %c0_8] : memref<1x64xf32, #tpu.memory_space<vmem>>, vector<1x64xf32>
    %8 = vector.shape_cast %7 : vector<1x64xf32> to vector<1x64xf32>
    %9 = vector.broadcast %8 : vector<1x64xf32> to vector<16x64xf32>
    %c0_9 = arith.constant 0 : index
    %c0_10 = arith.constant 0 : index
    %10 = vector.load %arg6[%c0_9, %c0_10] : memref<24x32xbf16, #tpu.memory_space<vmem>>, vector<16x32xbf16>
    %c0_11 = arith.constant 0 : index
    %c0_12 = arith.constant 0 : index
    %c0_13 = arith.constant 0 : index
    %c0_14 = arith.constant 0 : index
    %11 = vector.load %arg3[%c0_11, %c0_12, %c0_13, %c0_14] : memref<1x9x32x64xbf16, #tpu.memory_space<vmem>>, vector<1x1x32x64xbf16>
    %12 = vector.shape_cast %11 : vector<1x1x32x64xbf16> to vector<32x64xbf16>
    %cst_15 = arith.constant dense<0.000000e+00> : vector<16x64xf32>
    %13 = tpu.matmul %10, %12, %cst_15 {dimension_numbers = #tpu.dot_dimension_numbers<[1], [0], [0], [1], [0, 0, 1, 1], [], []>} : vector<16x32xbf16>, vector<32x64xbf16>, vector<16x64xf32> -> vector<16x64xf32>
    %14 = arith.addf %9, %13 : vector<16x64xf32>
    %c1 = arith.constant 1 : index
    %c0_16 = arith.constant 0 : index
    %15 = vector.load %arg6[%c1, %c0_16] : memref<24x32xbf16, #tpu.memory_space<vmem>>, vector<16x32xbf16>
    %c0_17 = arith.constant 0 : index
    %c1_18 = arith.constant 1 : index
    %c0_19 = arith.constant 0 : index
    %c0_20 = arith.constant 0 : index
    %16 = vector.load %arg3[%c0_17, %c1_18, %c0_19, %c0_20] : memref<1x9x32x64xbf16, #tpu.memory_space<vmem>>, vector<1x1x32x64xbf16>
    %17 = vector.shape_cast %16 : vector<1x1x32x64xbf16> to vector<32x64xbf16>
    %cst_21 = arith.constant dense<0.000000e+00> : vector<16x64xf32>
    %18 = tpu.matmul %15, %17, %cst_21 {dimension_numbers = #tpu.dot_dimension_numbers<[1], [0], [0], [1], [0, 0, 1, 1], [], []>} : vector<16x32xbf16>, vector<32x64xbf16>, vector<16x64xf32> -> vector<16x64xf32>
    %19 = arith.addf %14, %18 : vector<16x64xf32>
    %c2 = arith.constant 2 : index
    %c0_22 = arith.constant 0 : index
    %20 = vector.load %arg6[%c2, %c0_22] : memref<24x32xbf16, #tpu.memory_space<vmem>>, vector<16x32xbf16>
    %c0_23 = arith.constant 0 : index
    %c2_24 = arith.constant 2 : index
    %c0_25 = arith.constant 0 : index
    %c0_26 = arith.constant 0 : index
    %21 = vector.load %arg3[%c0_23, %c2_24, %c0_25, %c0_26] : memref<1x9x32x64xbf16, #tpu.memory_space<vmem>>, vector<1x1x32x64xbf16>
    %22 = vector.shape_cast %21 : vector<1x1x32x64xbf16> to vector<32x64xbf16>
    %cst_27 = arith.constant dense<0.000000e+00> : vector<16x64xf32>
    %23 = tpu.matmul %20, %22, %cst_27 {dimension_numbers = #tpu.dot_dimension_numbers<[1], [0], [0], [1], [0, 0, 1, 1], [], []>} : vector<16x32xbf16>, vector<32x64xbf16>, vector<16x64xf32> -> vector<16x64xf32>
    %24 = arith.addf %19, %23 : vector<16x64xf32>
    %c3 = arith.constant 3 : index
    %c0_28 = arith.constant 0 : index
    %25 = vector.load %arg6[%c3, %c0_28] : memref<24x32xbf16, #tpu.memory_space<vmem>>, vector<16x32xbf16>
    %c0_29 = arith.constant 0 : index
    %c3_30 = arith.constant 3 : index
    %c0_31 = arith.constant 0 : index
    %c0_32 = arith.constant 0 : index
    %26 = vector.load %arg3[%c0_29, %c3_30, %c0_31, %c0_32] : memref<1x9x32x64xbf16, #tpu.memory_space<vmem>>, vector<1x1x32x64xbf16>
    %27 = vector.shape_cast %26 : vector<1x1x32x64xbf16> to vector<32x64xbf16>
    %cst_33 = arith.constant dense<0.000000e+00> : vector<16x64xf32>
    %28 = tpu.matmul %25, %27, %cst_33 {dimension_numbers = #tpu.dot_dimension_numbers<[1], [0], [0], [1], [0, 0, 1, 1], [], []>} : vector<16x32xbf16>, vector<32x64xbf16>, vector<16x64xf32> -> vector<16x64xf32>
    %29 = arith.addf %24, %28 : vector<16x64xf32>
    %c4_34 = arith.constant 4 : index
    %c0_35 = arith.constant 0 : index
    %30 = vector.load %arg6[%c4_34, %c0_35] : memref<24x32xbf16, #tpu.memory_space<vmem>>, vector<16x32xbf16>
    %c0_36 = arith.constant 0 : index
    %c4_37 = arith.constant 4 : index
    %c0_38 = arith.constant 0 : index
    %c0_39 = arith.constant 0 : index
    %31 = vector.load %arg3[%c0_36, %c4_37, %c0_38, %c0_39] : memref<1x9x32x64xbf16, #tpu.memory_space<vmem>>, vector<1x1x32x64xbf16>
    %32 = vector.shape_cast %31 : vector<1x1x32x64xbf16> to vector<32x64xbf16>
    %cst_40 = arith.constant dense<0.000000e+00> : vector<16x64xf32>
    %33 = tpu.matmul %30, %32, %cst_40 {dimension_numbers = #tpu.dot_dimension_numbers<[1], [0], [0], [1], [0, 0, 1, 1], [], []>} : vector<16x32xbf16>, vector<32x64xbf16>, vector<16x64xf32> -> vector<16x64xf32>
    %34 = arith.addf %29, %33 : vector<16x64xf32>
    %c5 = arith.constant 5 : index
    %c0_41 = arith.constant 0 : index
    %35 = vector.load %arg6[%c5, %c0_41] : memref<24x32xbf16, #tpu.memory_space<vmem>>, vector<16x32xbf16>
    %c0_42 = arith.constant 0 : index
    %c5_43 = arith.constant 5 : index
    %c0_44 = arith.constant 0 : index
    %c0_45 = arith.constant 0 : index
    %36 = vector.load %arg3[%c0_42, %c5_43, %c0_44, %c0_45] : memref<1x9x32x64xbf16, #tpu.memory_space<vmem>>, vector<1x1x32x64xbf16>
    %37 = vector.shape_cast %36 : vector<1x1x32x64xbf16> to vector<32x64xbf16>
    %cst_46 = arith.constant dense<0.000000e+00> : vector<16x64xf32>
    %38 = tpu.matmul %35, %37, %cst_46 {dimension_numbers = #tpu.dot_dimension_numbers<[1], [0], [0], [1], [0, 0, 1, 1], [], []>} : vector<16x32xbf16>, vector<32x64xbf16>, vector<16x64xf32> -> vector<16x64xf32>
    %39 = arith.addf %34, %38 : vector<16x64xf32>
    %c6 = arith.constant 6 : index
    %c0_47 = arith.constant 0 : index
    %40 = vector.load %arg6[%c6, %c0_47] : memref<24x32xbf16, #tpu.memory_space<vmem>>, vector<16x32xbf16>
    %c0_48 = arith.constant 0 : index
    %c6_49 = arith.constant 6 : index
    %c0_50 = arith.constant 0 : index
    %c0_51 = arith.constant 0 : index
    %41 = vector.load %arg3[%c0_48, %c6_49, %c0_50, %c0_51] : memref<1x9x32x64xbf16, #tpu.memory_space<vmem>>, vector<1x1x32x64xbf16>
    %42 = vector.shape_cast %41 : vector<1x1x32x64xbf16> to vector<32x64xbf16>
    %cst_52 = arith.constant dense<0.000000e+00> : vector<16x64xf32>
    %43 = tpu.matmul %40, %42, %cst_52 {dimension_numbers = #tpu.dot_dimension_numbers<[1], [0], [0], [1], [0, 0, 1, 1], [], []>} : vector<16x32xbf16>, vector<32x64xbf16>, vector<16x64xf32> -> vector<16x64xf32>
    %44 = arith.addf %39, %43 : vector<16x64xf32>
    %c7 = arith.constant 7 : index
    %c0_53 = arith.constant 0 : index
    %45 = vector.load %arg6[%c7, %c0_53] : memref<24x32xbf16, #tpu.memory_space<vmem>>, vector<16x32xbf16>
    %c0_54 = arith.constant 0 : index
    %c7_55 = arith.constant 7 : index
    %c0_56 = arith.constant 0 : index
    %c0_57 = arith.constant 0 : index
    %46 = vector.load %arg3[%c0_54, %c7_55, %c0_56, %c0_57] : memref<1x9x32x64xbf16, #tpu.memory_space<vmem>>, vector<1x1x32x64xbf16>
    %47 = vector.shape_cast %46 : vector<1x1x32x64xbf16> to vector<32x64xbf16>
    %cst_58 = arith.constant dense<0.000000e+00> : vector<16x64xf32>
    %48 = tpu.matmul %45, %47, %cst_58 {dimension_numbers = #tpu.dot_dimension_numbers<[1], [0], [0], [1], [0, 0, 1, 1], [], []>} : vector<16x32xbf16>, vector<32x64xbf16>, vector<16x64xf32> -> vector<16x64xf32>
    %49 = arith.addf %44, %48 : vector<16x64xf32>
    %c8 = arith.constant 8 : index
    %c0_59 = arith.constant 0 : index
    %50 = vector.load %arg6[%c8, %c0_59] : memref<24x32xbf16, #tpu.memory_space<vmem>>, vector<16x32xbf16>
    %c0_60 = arith.constant 0 : index
    %c8_61 = arith.constant 8 : index
    %c0_62 = arith.constant 0 : index
    %c0_63 = arith.constant 0 : index
    %51 = vector.load %arg3[%c0_60, %c8_61, %c0_62, %c0_63] : memref<1x9x32x64xbf16, #tpu.memory_space<vmem>>, vector<1x1x32x64xbf16>
    %52 = vector.shape_cast %51 : vector<1x1x32x64xbf16> to vector<32x64xbf16>
    %cst_64 = arith.constant dense<0.000000e+00> : vector<16x64xf32>
    %53 = tpu.matmul %50, %52, %cst_64 {dimension_numbers = #tpu.dot_dimension_numbers<[1], [0], [0], [1], [0, 0, 1, 1], [], []>} : vector<16x32xbf16>, vector<32x64xbf16>, vector<16x64xf32> -> vector<16x64xf32>
    %54 = arith.addf %49, %53 : vector<16x64xf32>
    %55 = vector.extract_strided_slice %54 {offsets = [0, 0], sizes = [16, 32], strides = [1, 1]} : vector<16x64xf32> to vector<16x32xf32>
    %56 = vector.extract_strided_slice %54 {offsets = [0, 32], sizes = [16, 32], strides = [1, 1]} : vector<16x64xf32> to vector<16x32xf32>
    %cst_65 = arith.constant dense<0xFF800000> : vector<32xf32>
    %57 = vector.multi_reduction <maximumf>, %56, %cst_65 [0] : vector<16x32xf32> to vector<32xf32>
    %58 = vector.shape_cast %57 : vector<32xf32> to vector<1x32xf32>
    %59 = vector.broadcast %58 : vector<1x32xf32> to vector<16x32xf32>
    %60 = arith.subf %56, %59 : vector<16x32xf32>
    %61 = math.exp %60 : vector<16x32xf32>
    %cst_66 = arith.constant dense<0.000000e+00> : vector<32xf32>
    %62 = vector.multi_reduction <add>, %61, %cst_66 [0] : vector<16x32xf32> to vector<32xf32>
    %63 = vector.shape_cast %62 : vector<32xf32> to vector<1x32xf32>
    %64 = tpu.reciprocal %63 : vector<1x32xf32> -> vector<1x32xf32>
    %65 = vector.broadcast %64 : vector<1x32xf32> to vector<16x32xf32>
    %66 = arith.mulf %61, %65 : vector<16x32xf32>
    %67 = arith.mulf %55, %66 : vector<16x32xf32>
    %c0_67 = arith.constant 0 : index
    %c0_68 = arith.constant 0 : index
    %c0_69 = arith.constant 0 : index
    %68 = vector.load %arg5[%c0_67, %c0_68, %c0_69] : memref<1x16x32xf32, #tpu.memory_space<vmem>>, vector<1x16x32xf32>
    %69 = vector.shape_cast %68 : vector<1x16x32xf32> to vector<16x32xf32>
    %70 = vector.shape_cast %67 : vector<16x32xf32> to vector<1x16x32xf32>
    tpu.vector_store %arg5[%c0_67, %c0_68, %c0_69], %70 {strides = array<i32>} : memref<1x16x32xf32, #tpu.memory_space<vmem>>, vector<1x16x32xf32>,
    return
  }
  func.func @transform_0(%arg0: i32, %arg1: i32) -> (i32, i32, i32) {
    %c0_i32 = arith.constant 0 : i32
    %c0_i32_0 = arith.constant 0 : i32
    %c0_i32_1 = arith.constant 0 : i32
    return %arg1, %c0_i32, %c0_i32_0 : i32, i32, i32
  }
  func.func @transform_1(%arg0: i32, %arg1: i32) -> (i32, i32, i32, i32) {
    %c0_i32 = arith.constant 0 : i32
    %c0_i32_0 = arith.constant 0 : i32
    %c0_i32_1 = arith.constant 0 : i32
    %c0_i32_2 = arith.constant 0 : i32
    return %arg0, %c0_i32, %c0_i32_0, %c0_i32_1 : i32, i32, i32, i32
  }
  func.func @transform_2(%arg0: i32, %arg1: i32) -> (i32, i32) {
    %c0_i32 = arith.constant 0 : i32
    %c0_i32_0 = arith.constant 0 : i32
    return %c0_i32, %arg0 : i32, i32
  }
  func.func @transform_3(%arg0: i32, %arg1: i32) -> (i32, i32, i32) {
    %c0_i32 = arith.constant 0 : i32
    %c0_i32_0 = arith.constant 0 : i32
    return %arg1, %c0_i32, %arg0 : i32, i32, i32
  }
}

module attributes {stable_mosaic.version = 11 : i64} {
  func.func @light_attention_kernel(%arg0: i32, %arg1: i32, %arg2: memref<1x16x32xbf16, #tpu.memory_space<vmem>>, %arg3: memref<1x9x32x64xbf16, #tpu.memory_space<vmem>>, %arg4: memref<1x64xf32, #tpu.memory_space<vmem>>, %arg5: memref<1x16x32xf32, #tpu.memory_space<vmem>>, %arg6: memref<24x32xbf16, #tpu.memory_space<vmem>>) attributes {dimension_semantics = [#tpu.dimension_semantics<parallel>, #tpu.dimension_semantics<parallel>], iteration_bounds = array<i64: 1, 2>, scalar_prefetch = 0 : i64, scratch_operands = 1 : i64, tpu.core_type = #tpu.core_type<tc>, window_params = [{transform_indices = @transform_0, window_bounds = array<i64: 1, 16, 32>}, {transform_indices = @transform_1, window_bounds = array<i64: 1, 9, 32, 64>}, {transform_indices = @transform_2, window_bounds = array<i64: 1, 64>}, {transform_indices = @transform_3, window_bounds = array<i64: 1, 16, 32>}]} {
    %cst = arith.constant 0.000000e+00 : bf16
    %0 = vector.broadcast %cst : bf16 to vector<4x32xbf16>
    %c0 = arith.constant 0 : index
    %c0_0 = arith.constant 0 : index
    %1 = vector.load %arg6[%c0, %c0_0] : memref<24x32xbf16, #tpu.memory_space<vmem>>, vector<4x32xbf16>
    tpu.vector_store %arg6[%c0, %c0_0], %0 {strides = array<i32>} : memref<24x32xbf16, #tpu.memory_space<vmem>>, vector<4x32xbf16>,
    %cst_1 = arith.constant 0.000000e+00 : bf16
    %2 = vector.broadcast %cst_1 : bf16 to vector<4x32xbf16>
    %c20 = arith.constant 20 : index
    %c0_2 = arith.constant 0 : index
    %3 = vector.load %arg6[%c20, %c0_2] : memref<24x32xbf16, #tpu.memory_space<vmem>>, vector<4x32xbf16>
    tpu.vector_store %arg6[%c20, %c0_2], %2 {strides = array<i32>} : memref<24x32xbf16, #tpu.memory_space<vmem>>, vector<4x32xbf16>,
    %c0_3 = arith.constant 0 : index
    %c0_4 = arith.constant 0 : index
    %c0_5 = arith.constant 0 : index
    %4 = vector.load %arg2[%c0_3, %c0_4, %c0_5] : memref<1x16x32xbf16, #tpu.memory_space<vmem>>, vector<1x16x32xbf16>
    %5 = vector.shape_cast %4 : vector<1x16x32xbf16> to vector<16x32xbf16>
    %c4 = arith.constant 4 : index
    %c0_6 = arith.constant 0 : index
    %6 = vector.load %arg6[%c4, %c0_6] : memref<24x32xbf16, #tpu.memory_space<vmem>>, vector<16x32xbf16>
    tpu.vector_store %arg6[%c4, %c0_6], %5 {strides = array<i32>} : memref<24x32xbf16, #tpu.memory_space<vmem>>, vector<16x32xbf16>,
    %c0_7 = arith.constant 0 : index
    %c0_8 = arith.constant 0 : index
    %7 = vector.load %arg4[%c0_7, %c0_8] : memref<1x64xf32, #tpu.memory_space<vmem>>, vector<1x64xf32>
    %8 = vector.shape_cast %7 : vector<1x64xf32> to vector<1x64xf32>
    %9 = vector.broadcast %8 : vector<1x64xf32> to vector<16x64xf32>
    %c0_9 = arith.constant 0 : index
    %c0_10 = arith.constant 0 : index
    %10 = vector.load %arg6[%c0_9, %c0_10] : memref<24x32xbf16, #tpu.memory_space<vmem>>, vector<16x32xbf16>
    %c0_11 = arith.constant 0 : index
    %c0_12 = arith.constant 0 : index
    %c0_13 = arith.constant 0 : index
    %c0_14 = arith.constant 0 : index
    %11 = vector.load %arg3[%c0_11, %c0_12, %c0_13, %c0_14] : memref<1x9x32x64xbf16, #tpu.memory_space<vmem>>, vector<1x1x32x64xbf16>
    %12 = vector.shape_cast %11 : vector<1x1x32x64xbf16> to vector<32x64xbf16>
    %cst_15 = arith.constant dense<0.000000e+00> : vector<16x64xf32>
    %13 = tpu.matmul %10, %12, %cst_15 {dimension_numbers = #tpu.dot_dimension_numbers<[1], [0], [0], [1], [0, 0, 1, 1], [], []>} : vector<16x32xbf16>, vector<32x64xbf16>, vector<16x64xf32> -> vector<16x64xf32>
    %14 = arith.addf %9, %13 : vector<16x64xf32>
    %c1 = arith.constant 1 : index
    %c0_16 = arith.constant 0 : index
    %15 = vector.load %arg6[%c1, %c0_16] : memref<24x32xbf16, #tpu.memory_space<vmem>>, vector<16x32xbf16>
    %c0_17 = arith.constant 0 : index
    %c1_18 = arith.constant 1 : index
    %c0_19 = arith.constant 0 : index
    %c0_20 = arith.constant 0 : index
    %16 = vector.load %arg3[%c0_17, %c1_18, %c0_19, %c0_20] : memref<1x9x32x64xbf16, #tpu.memory_space<vmem>>, vector<1x1x32x64xbf16>
    %17 = vector.shape_cast %16 : vector<1x1x32x64xbf16> to vector<32x64xbf16>
    %cst_21 = arith.constant dense<0.000000e+00> : vector<16x64xf32>
    %18 = tpu.matmul %15, %17, %cst_21 {dimension_numbers = #tpu.dot_dimension_numbers<[1], [0], [0], [1], [0, 0, 1, 1], [], []>} : vector<16x32xbf16>, vector<32x64xbf16>, vector<16x64xf32> -> vector<16x64xf32>
    %19 = arith.addf %14, %18 : vector<16x64xf32>
    %c2 = arith.constant 2 : index
    %c0_22 = arith.constant 0 : index
    %20 = vector.load %arg6[%c2, %c0_22] : memref<24x32xbf16, #tpu.memory_space<vmem>>, vector<16x32xbf16>
    %c0_23 = arith.constant 0 : index
    %c2_24 = arith.constant 2 : index
    %c0_25 = arith.constant 0 : index
    %c0_26 = arith.constant 0 : index
    %21 = vector.load %arg3[%c0_23, %c2_24, %c0_25, %c0_26] : memref<1x9x32x64xbf16, #tpu.memory_space<vmem>>, vector<1x1x32x64xbf16>
    %22 = vector.shape_cast %21 : vector<1x1x32x64xbf16> to vector<32x64xbf16>
    %cst_27 = arith.constant dense<0.000000e+00> : vector<16x64xf32>
    %23 = tpu.matmul %20, %22, %cst_27 {dimension_numbers = #tpu.dot_dimension_numbers<[1], [0], [0], [1], [0, 0, 1, 1], [], []>} : vector<16x32xbf16>, vector<32x64xbf16>, vector<16x64xf32> -> vector<16x64xf32>
    %24 = arith.addf %19, %23 : vector<16x64xf32>
    %c3 = arith.constant 3 : index
    %c0_28 = arith.constant 0 : index
    %25 = vector.load %arg6[%c3, %c0_28] : memref<24x32xbf16, #tpu.memory_space<vmem>>, vector<16x32xbf16>
    %c0_29 = arith.constant 0 : index
    %c3_30 = arith.constant 3 : index
    %c0_31 = arith.constant 0 : index
    %c0_32 = arith.constant 0 : index
    %26 = vector.load %arg3[%c0_29, %c3_30, %c0_31, %c0_32] : memref<1x9x32x64xbf16, #tpu.memory_space<vmem>>, vector<1x1x32x64xbf16>
    %27 = vector.shape_cast %26 : vector<1x1x32x64xbf16> to vector<32x64xbf16>
    %cst_33 = arith.constant dense<0.000000e+00> : vector<16x64xf32>
    %28 = tpu.matmul %25, %27, %cst_33 {dimension_numbers = #tpu.dot_dimension_numbers<[1], [0], [0], [1], [0, 0, 1, 1], [], []>} : vector<16x32xbf16>, vector<32x64xbf16>, vector<16x64xf32> -> vector<16x64xf32>
    %29 = arith.addf %24, %28 : vector<16x64xf32>
    %c4_34 = arith.constant 4 : index
    %c0_35 = arith.constant 0 : index
    %30 = vector.load %arg6[%c4_34, %c0_35] : memref<24x32xbf16, #tpu.memory_space<vmem>>, vector<16x32xbf16>
    %c0_36 = arith.constant 0 : index
    %c4_37 = arith.constant 4 : index
    %c0_38 = arith.constant 0 : index
    %c0_39 = arith.constant 0 : index
    %31 = vector.load %arg3[%c0_36, %c4_37, %c0_38, %c0_39] : memref<1x9x32x64xbf16, #tpu.memory_space<vmem>>, vector<1x1x32x64xbf16>
    %32 = vector.shape_cast %31 : vector<1x1x32x64xbf16> to vector<32x64xbf16>
    %cst_40 = arith.constant dense<0.000000e+00> : vector<16x64xf32>
    %33 = tpu.matmul %30, %32, %cst_40 {dimension_numbers = #tpu.dot_dimension_numbers<[1], [0], [0], [1], [0, 0, 1, 1], [], []>} : vector<16x32xbf16>, vector<32x64xbf16>, vector<16x64xf32> -> vector<16x64xf32>
    %34 = arith.addf %29, %33 : vector<16x64xf32>
    %c5 = arith.constant 5 : index
    %c0_41 = arith.constant 0 : index
    %35 = vector.load %arg6[%c5, %c0_41] : memref<24x32xbf16, #tpu.memory_space<vmem>>, vector<16x32xbf16>
    %c0_42 = arith.constant 0 : index
    %c5_43 = arith.constant 5 : index
    %c0_44 = arith.constant 0 : index
    %c0_45 = arith.constant 0 : index
    %36 = vector.load %arg3[%c0_42, %c5_43, %c0_44, %c0_45] : memref<1x9x32x64xbf16, #tpu.memory_space<vmem>>, vector<1x1x32x64xbf16>
    %37 = vector.shape_cast %36 : vector<1x1x32x64xbf16> to vector<32x64xbf16>
    %cst_46 = arith.constant dense<0.000000e+00> : vector<16x64xf32>
    %38 = tpu.matmul %35, %37, %cst_46 {dimension_numbers = #tpu.dot_dimension_numbers<[1], [0], [0], [1], [0, 0, 1, 1], [], []>} : vector<16x32xbf16>, vector<32x64xbf16>, vector<16x64xf32> -> vector<16x64xf32>
    %39 = arith.addf %34, %38 : vector<16x64xf32>
    %c6 = arith.constant 6 : index
    %c0_47 = arith.constant 0 : index
    %40 = vector.load %arg6[%c6, %c0_47] : memref<24x32xbf16, #tpu.memory_space<vmem>>, vector<16x32xbf16>
    %c0_48 = arith.constant 0 : index
    %c6_49 = arith.constant 6 : index
    %c0_50 = arith.constant 0 : index
    %c0_51 = arith.constant 0 : index
    %41 = vector.load %arg3[%c0_48, %c6_49, %c0_50, %c0_51] : memref<1x9x32x64xbf16, #tpu.memory_space<vmem>>, vector<1x1x32x64xbf16>
    %42 = vector.shape_cast %41 : vector<1x1x32x64xbf16> to vector<32x64xbf16>
    %cst_52 = arith.constant dense<0.000000e+00> : vector<16x64xf32>
    %43 = tpu.matmul %40, %42, %cst_52 {dimension_numbers = #tpu.dot_dimension_numbers<[1], [0], [0], [1], [0, 0, 1, 1], [], []>} : vector<16x32xbf16>, vector<32x64xbf16>, vector<16x64xf32> -> vector<16x64xf32>
    %44 = arith.addf %39, %43 : vector<16x64xf32>
    %c7 = arith.constant 7 : index
    %c0_53 = arith.constant 0 : index
    %45 = vector.load %arg6[%c7, %c0_53] : memref<24x32xbf16, #tpu.memory_space<vmem>>, vector<16x32xbf16>
    %c0_54 = arith.constant 0 : index
    %c7_55 = arith.constant 7 : index
    %c0_56 = arith.constant 0 : index
    %c0_57 = arith.constant 0 : index
    %46 = vector.load %arg3[%c0_54, %c7_55, %c0_56, %c0_57] : memref<1x9x32x64xbf16, #tpu.memory_space<vmem>>, vector<1x1x32x64xbf16>
    %47 = vector.shape_cast %46 : vector<1x1x32x64xbf16> to vector<32x64xbf16>
    %cst_58 = arith.constant dense<0.000000e+00> : vector<16x64xf32>
    %48 = tpu.matmul %45, %47, %cst_58 {dimension_numbers = #tpu.dot_dimension_numbers<[1], [0], [0], [1], [0, 0, 1, 1], [], []>} : vector<16x32xbf16>, vector<32x64xbf16>, vector<16x64xf32> -> vector<16x64xf32>
    %49 = arith.addf %44, %48 : vector<16x64xf32>
    %c8 = arith.constant 8 : index
    %c0_59 = arith.constant 0 : index
    %50 = vector.load %arg6[%c8, %c0_59] : memref<24x32xbf16, #tpu.memory_space<vmem>>, vector<16x32xbf16>
    %c0_60 = arith.constant 0 : index
    %c8_61 = arith.constant 8 : index
    %c0_62 = arith.constant 0 : index
    %c0_63 = arith.constant 0 : index
    %51 = vector.load %arg3[%c0_60, %c8_61, %c0_62, %c0_63] : memref<1x9x32x64xbf16, #tpu.memory_space<vmem>>, vector<1x1x32x64xbf16>
    %52 = vector.shape_cast %51 : vector<1x1x32x64xbf16> to vector<32x64xbf16>
    %cst_64 = arith.constant dense<0.000000e+00> : vector<16x64xf32>
    %53 = tpu.matmul %50, %52, %cst_64 {dimension_numbers = #tpu.dot_dimension_numbers<[1], [0], [0], [1], [0, 0, 1, 1], [], []>} : vector<16x32xbf16>, vector<32x64xbf16>, vector<16x64xf32> -> vector<16x64xf32>
    %54 = arith.addf %49, %53 : vector<16x64xf32>
    %55 = vector.extract_strided_slice %54 {offsets = [0, 0], sizes = [16, 32], strides = [1, 1]} : vector<16x64xf32> to vector<16x32xf32>
    %56 = vector.extract_strided_slice %54 {offsets = [0, 32], sizes = [16, 32], strides = [1, 1]} : vector<16x64xf32> to vector<16x32xf32>
    %cst_65 = arith.constant dense<0xFF800000> : vector<32xf32>
    %57 = vector.multi_reduction <maximumf>, %56, %cst_65 [0] : vector<16x32xf32> to vector<32xf32>
    %58 = vector.shape_cast %57 : vector<32xf32> to vector<1x32xf32>
    %59 = vector.broadcast %58 : vector<1x32xf32> to vector<16x32xf32>
    %60 = arith.subf %56, %59 : vector<16x32xf32>
    %61 = math.exp %60 : vector<16x32xf32>
    %cst_66 = arith.constant dense<0.000000e+00> : vector<32xf32>
    %62 = vector.multi_reduction <add>, %61, %cst_66 [0] : vector<16x32xf32> to vector<32xf32>
    %63 = vector.shape_cast %62 : vector<32xf32> to vector<1x32xf32>
    %64 = tpu.reciprocal %63 : vector<1x32xf32> -> vector<1x32xf32>
    %65 = vector.broadcast %64 : vector<1x32xf32> to vector<16x32xf32>
    %66 = arith.mulf %61, %65 : vector<16x32xf32>
    %67 = arith.mulf %55, %66 : vector<16x32xf32>
    %c0_67 = arith.constant 0 : index
    %c0_68 = arith.constant 0 : index
    %c0_69 = arith.constant 0 : index
    %68 = vector.load %arg5[%c0_67, %c0_68, %c0_69] : memref<1x16x32xf32, #tpu.memory_space<vmem>>, vector<1x16x32xf32>
    %69 = vector.shape_cast %68 : vector<1x16x32xf32> to vector<16x32xf32>
    %70 = vector.shape_cast %67 : vector<16x32xf32> to vector<1x16x32xf32>
    tpu.vector_store %arg5[%c0_67, %c0_68, %c0_69], %70 {strides = array<i32>} : memref<1x16x32xf32, #tpu.memory_space<vmem>>, vector<1x16x32xf32>,
    return
  }
  func.func @transform_0(%arg0: i32, %arg1: i32) -> (i32, i32, i32) {
    %c0_i32 = arith.constant 0 : i32
    %c0_i32_0 = arith.constant 0 : i32
    %c0_i32_1 = arith.constant 0 : i32
    return %arg1, %c0_i32, %c0_i32_0 : i32, i32, i32
  }
  func.func @transform_1(%arg0: i32, %arg1: i32) -> (i32, i32, i32, i32) {
    %c0_i32 = arith.constant 0 : i32
    %c0_i32_0 = arith.constant 0 : i32
    %c0_i32_1 = arith.constant 0 : i32
    %c0_i32_2 = arith.constant 0 : i32
    return %arg0, %c0_i32, %c0_i32_0, %c0_i32_1 : i32, i32, i32, i32
  }
  func.func @transform_2(%arg0: i32, %arg1: i32) -> (i32, i32) {
    %c0_i32 = arith.constant 0 : i32
    %c0_i32_0 = arith.constant 0 : i32
    return %c0_i32, %arg0 : i32, i32
  }
  func.func @transform_3(%arg0: i32, %arg1: i32) -> (i32, i32, i32) {
    %c0_i32 = arith.constant 0 : i32
    %c0_i32_0 = arith.constant 0 : i32
    return %arg1, %c0_i32, %arg0 : i32, i32, i32
  }
}

</mosaic_0001>

<bundles_post_ra>
// kernel: tpu_custom_call.1
= control target key start
LH: loop header
LB: loop body
LE: loop exit
PB: predicated region body
PF: predicated region fallthrough
CT: control target
= control target key end

     0   :  { %8 = vsyncpa [#allocation4], 0  ;;  %s1831_s0 = inlined_call_operand.hbm [shape: bf16[2,16,32], index: 0, kind: input, shape index: {}]   ;;  %s1832_s1 = inlined_call_operand.hbm [shape: bf16[1,9,32,64], index: 1, kind: input, shape index: {}]   ;;  %s1833_s2 = inlined_call_operand.vmem [shape: f32[1,64], index: 2, kind: input, shape index: {}]   ;;  %s1834_s3 = inlined_call_operand.hbm [shape: f32[2,16,32], index: 3, kind: output, shape index: {}]  }
   0x1   :  { %10 = vsyncpa [#allocation4 + $0x1], 0 }
   0x2   :  { %11 = vsyncpa [#allocation7], 0 }
   0x3   :  { %12 = vsyncpa [#allocation5], 0 }
   0x4   :  { %14 = vsyncpa [#allocation5 + $0x1], 0  ;;  %s1565_s12 = smov 0   ;;  %s1567_s13 = smov 0  }
   0x5   :  { %s1569_s14 = smov 0   ;;  %s1571_s15 = smov 0  }
   0x6   :  { %s1573_s16 = smov 0   ;;  %s1575_s17 = smov 0  }
   0x7 LB: > { %s1122_s18 = sadd.s32 4294967295, %s1532_s17   ;;  %s1123_s19 = sadd.s32 4294967294, %s1532_s17   ;;  %s1532_s17 = sphi %s1575_s17, %s20_s17   ;;  %s1528_s16 = sphi %s1573_s16, %s1856_s16   ;;  %s1524_s15 = sphi %s1571_s15, %s1855_s15   ;;  %s1520_s14 = sphi %s1569_s14, %s1854_s14   ;;  %s1516_s13 = sphi %s1567_s13, %s1853_s13   ;;  %s1512_s12 = sphi %s1565_s12, %s1852_s12  }
   0x8   : > { %p52_p0 = scmp.ne.s32.totalorder %s1516_s13, %s1512_s12  ;;  %p1599_p1 = scmp.eq.s32.totalorder %s1122_s18, 0 }
   0x9   : > { %p1603_p2 = scmp.eq.s32.totalorder %s1122_s18, 1  ;;  %p136_p3 = scmp.eq.s32.totalorder %s1123_s19, 1 }
   0xa   : > { %p1609_p4 = por %p1599_p1, %p52_p0  ;;  %p1124_p5 = scmp.ge.s32.totalorder %s1532_s17, 1 }
   0xb   : > { %p1614_p6 = por %p136_p3, %p52_p0  ;;  %p143_p7 = scmp.lt.s32.totalorder %s1532_s17, 3 }
   0xc   : > { %s1840_s22 = scalar_select %p1609_p4, 1, 0 }
   0xd   : > { %s1841_s23 = scalar_select %p1614_p6, 1, 0 }
   0xe   : > { %p1619_p8 = pnand %p1124_p5, %p143_p7  ;;  %s1534_s25 = smov [#allocation6]  }
   0xf   : > { %s158_s26 = sshll.u32 %s1534_s25, 4  ;;  %s29_s28 = sadd.s32 1, %s1528_s16  ;;  %s159_s26 = int_to_ptr.vmem [resolvable:$true] %s158_s26 }
  0x10   : > { %p1287_p9 = pneg %p1619_p8  ;;  %s1405_s29 = scalar_lea.vmem %s159_s26, 2304 }
  0x11   : > { %p1406_p13 = scmp.ne.s32.totalorder %s159_s26, %s1405_s29  ;;  %p1413_p5 = scmp.lt.s32.totalorder %s159_s26, %s159_s26 }
  0x12   : > { %p1628_p11 = pnand %p1287_p9, %p1599_p1  ;;  %p1414_p7 = scmp.lt.s32.totalorder %s1405_s29, %s1405_s29 }
  0x14   : > { %p1396_p12 = pneg %p1628_p11  ;;  %p1415_p6 = por %p1414_p7, %p1413_p5 }
  0x16   : > { %p1408_p0 = pnand %p1406_p13, %p1396_p12 }
  0x18   : > { %p1409_p3 = pneg %p1408_p0 }
  0x1a   : > { %p1416_p4 = pnand %p1415_p6, %p1409_p3 }
  0x1c   : > { %1419 = shalt.err (!%p1416_p4)
}
  0x1d   : > { %s1836_s30 = smov 64   ;;  %s1837_s4 = smov 4  }
  0x1e   : > { %1290 = dma.hbm_to_vmem [thread:$0]  (!%p1628_p11), %s1832_s1, 2304, %s159_s26, [#allocation7], %s1836_s30, %s1836_s30, %s1837_s4  }
  0x1f   : > { %p30_p4 = scmp.ge.s32.totalorder %s29_s28, 2  ;;  %s39_s7 = sadd.s32 1, %s1520_s14 }
  0x20   : > { %p46_p6 = scmp.ne.s32.totalorder %s1520_s14, %s1516_s13  ;;  %p47_p9 = scmp.eq.s32.totalorder %s1532_s17, 0 }
  0x21   : > { %s1858_s28 = smov (%p30_p4, %s29_s28), 0  ;;  %p1300_p0 = scmp.lt.s32.totalorder %s1532_s17, 2 }
  0x22   : > { %p1649_p12 = por %p47_p9, %p46_p6  ;;  %p1655_p13 = por %p1603_p2, %p46_p6 }
  0x23   : > { %s36_s10 = ssub.s32 %s1528_s16, %s1858_s28  ;;  %s178_s11 = sand.u32 1, %s1520_s14  }
  0x24   : > { %p37_p11 = scmp.eq.s32.totalorder %s36_s10, 0  ;;  %s1128_s18 = sshll.u32 %s178_s11, 3 }
  0x25   : > { %s1178_s25 = sshll.u32 %s1528_s16, 7  ;;  %s182_s5 = scalar_lea.vmem [#allocation3], %s1128_s18 }
  0x26   : > { %s1664_s19 = scalar_select %p37_p11, %s1520_s14, %s39_s7  }
  0x27   : > { %s188_s29 = scalar_lea.hbm %s1831_s0, %s1178_s25  ;;  %s189_s6 = sshll.u32 %s182_s5, 4  ;;  %s190_s6 = int_to_ptr.vmem [resolvable:$true] %s189_s6 }
  0x28   : > { %p1672_p2 = pnand %p1300_p0, %p1649_p12  ;;  %s179_s30 = scalar_lea.sflag [#allocation4], %s178_s11 }
  0x29   : > { %s1433_s10 = scalar_lea.vmem %s190_s6, 128  ;;  %s1537_s7 = smov [#allocation3]  }
  0x2a   : > { %p1422_p3 = pneg %p1672_p2  ;;  %p1434_p5 = scmp.ne.s32.totalorder %s190_s6, %s1433_s10 }
  0x2b   : > { %s1438_s4 = sshll.u32 %s1537_s7, 4  ;;  %s1439_s4 = int_to_ptr.vmem [resolvable:$false] %s1438_s4 }
  0x2c   : > { %p1436_p7 = pnand %p1434_p5, %p1422_p3  ;;  %s1440_s25 = scalar_lea.vmem %s1439_s4, 256 }
  0x2d   : > { %p1441_p6 = scmp.lt.s32.totalorder %s190_s6, %s1439_s4  ;;  %p1442_p9 = scmp.lt.s32.totalorder %s1440_s25, %s1433_s10 }
  0x2e   : > { %p1437_p4 = pneg %p1436_p7 }
  0x2f   : > { %p1443_p11 = por %p1442_p9, %p1441_p6 }
  0x31   : > { %p1444_p10 = pnand %p1443_p11, %p1437_p4 }
  0x33   : > { %1447 = shalt.err (!%p1444_p10)
}
  0x34   : > { %s1847_s8 = smov 4   ;;  %s1848_s18 = smov 64  }
  0x35   : > { %1294 = dma.hbm_to_vmem [thread:$0]  (!%p1672_p2), %s188_s29, 128, %s190_s6, %s179_s30, %s1848_s18, %s1848_s18, %s1847_s8  }
  0x36   : > { %201 = sbr.rel (%p1619_p8) target bundleno = 514 (0x202), region = 32  ;;  %s1686_s11 = sand.u32 (!%p1619_p8), 1, %s1516_s13  }
  0x37   : > { %s1132_s4 = sshll.u32 (!%p1619_p8), %s1686_s11, 3  ;;  %s204_s26 = scalar_lea.sflag (!%p1619_p8), [#allocation4], %s1686_s11 }
  0x38   : > { %s207_s27 = scalar_lea.vmem (!%p1619_p8), [#allocation3], %s1132_s4  ;;  %p1849_p12 = scmp.ne.s32.totalorder (!%p1619_p8), %s1840_s22, 0 }
  0x3b   : > { %1499 = dma.done.wait (%p1849_p12), %s204_s26, 128  }
  0x3c   : > { %1501 = vsyncadd (%p1849_p12), %s204_s26, 4294967168 }
  0x3d   : > { %1503 = dma.done.wait (%p1599_p1), [#allocation7], 2304  }
  0x3e   : > { %1505 = vsyncadd (%p1599_p1), [#allocation7], 4294964992  ;;  %vm241_vm0 = vcmask 254976   ;;  %v1538_v0 = vmov 0.0   ;;  %v1539_v1 = vmov 0   ;;  %vm243_vm1 = vcmask 257026  }
  0x3f   : > { %1207 = vmatprep.subr.bf16.mxu0 %v1538_v0  ;;  %1215 = vmatprep.subr.bf16.mxu1 %v1538_v0  ;;  %242 = vst.msk [vmem:[#allocation2] sm:$0x3] %vm241_vm0, %v1539_v1  ;;  %vm1540_vm2 = vmmov 0   ;;  %v1360_v2 = vld [vmem:[#allocation6 + $0x8] sm:$0xff]   ;;  %vm249_vm3 = vcmask 1041408   ;;  %v1361_v3 = vld [vmem:[#allocation6] sm:$0xff]  }
  0x40   : > { %1211 = vmatprep.mubr.msk.bf16.mxu0 %vm1540_vm2, %v1538_v0  ;;  %244 = vst.msk [vmem:[#allocation2 + $0x8] sm:$0xc] %vm243_vm1, %v1539_v1  ;;  %1219 = vmatprep.mubr.msk.bf16.mxu1 %vm1540_vm2, %v1538_v0  ;;  %vm250_vm4 = vcmask 1045508   ;;  %v1362_v4 = vld [vmem:[#allocation6 + $0x18] sm:$0xff]   ;;  %v1365_v9 = vld [vmem:[#allocation6 + $0x10] sm:$0xff]   ;;  %vm261_vm6 = vcmask 257024  }
  0x41   : > { %1208 = vmatpush3.bf16.msra.mxu0 %v1360_v2  ;;  %v245_v5 = vld [vmem:[%s207_s27] sm:$0xf]  ;;  %v246_v6 = vld [vmem:[%s207_s27 + $0x4] sm:$0xf]  ;;  %1216 = vmatpush3.bf16.msra.mxu1 %v1362_v4  ;;  %vm251_vm5 = vmor %vm249_vm3, %vm250_vm4  ;;  %vm294_vm7 = vcmask 261120   ;;  %vm437_vm8 = vcmask 1046528  }
  0x42   : > { %1209 = vmatprep.subr.bf16.mxu0 %v1538_v0  ;;  %v252_v7 = vrot.slane %v245_v5, 6  ;;  %v254_v8 = vrot.slane %v246_v6, 6  ;;  %1217 = vmatprep.subr.bf16.mxu1 %v1538_v0  ;;  %v1364_v15 = vld [vmem:[#allocation6 + $0x28] sm:$0xff]   ;;  %v1366_v25 = vld [vmem:[#allocation6 + $0x20] sm:$0xff]   ;;  %vm357_vm9 = vsmask.f32 7424 }
  0x43   : > { %v1369_v35 = vld [vmem:[#allocation6 + $0x38] sm:$0xff]   ;;  %v1371_v41 = vld [vmem:[#allocation6 + $0x48] sm:$0xff]   ;;  %v1372_v46 = vld [vmem:[#allocation6 + $0x30] sm:$0xff]   ;;  %vm593_vm10 = vcmask 1045504   ;;  %vm508_vm11 = vsmask.f32 6400 }
  0x44   : > { %v253_v10 = vrot.slane %v252_v7, 4  ;;  %260 = vst.msk [vmem:[#allocation2] sm:$0xc] %vm243_vm1, %v252_v7  ;;  %v256_v11 = vrot.slane %v254_v8, 4  ;;  %v1373_v47 = vld [vmem:[#allocation6 + $0x40] sm:$0xff]   ;;  %v1375_v63 = vld [vmem:[#allocation6 + $0x58] sm:$0xff]  }
  0x45   : > { %1210 = vmatpush3.bf16.msra.mxu0 %v1361_v3  ;;  %1218 = vmatpush3.bf16.msra.mxu1 %v1365_v9  ;;  %v1377_v1 = vld [vmem:[#allocation6 + $0x68] sm:$0xff]   ;;  %vm749_vm12 = vcmask 1044480   ;;  %v1378_v9 = vld [vmem:[#allocation6 + $0x50] sm:$0xff]   ;;  %vm664_vm13 = vsmask.f32 5376  ;;  %vm960_vm15 = vcmask 523520  }
  0x46   : > { %1223 = vmatprep.subr.bf16.mxu0 %v1538_v0  ;;  %v255_v12 = vsel %vm251_vm5, %v253_v10, %v254_v8  ;;  %263 = vst.msk [vmem:[#allocation2 + $0x8] sm:$0x3] %vm241_vm0, %v256_v11  ;;  %1231 = vmatprep.subr.bf16.mxu1 %v1538_v0  ;;  %v1379_v10 = vld [vmem:[#allocation6 + $0x60] sm:$0xff]   ;;  %vm820_vm14 = vsmask.f32 4352  ;;  %s1541_s24 = smov 96  }
  0x47   : > { %262 = vst.msk [vmem:[#allocation2 + $0x4] sm:$0xf] %vm261_vm6, %v255_v12  ;;  %s1134_s30 = sshll.u32 %s1686_s11, 4  ;;  %s1179_s6 = sshll.u32 %s1524_s15, 8 }
  0x48   : > { %s236_s29 = scalar_lea.vmem [#allocation8], %s1134_s30  ;;  %s1782_s7 = scalar_lea.hbm %s1834_s3, %s1179_s6 }
  0x49   : > { %s1015_s5 = sshll.u32 %s236_s29, 4  ;;  %s1001_s25 = scalar_lea.sflag [#allocation5], %s1686_s11  ;;  %s1776_s5 = int_to_ptr.vmem [resolvable:$true] %s1015_s5 }
  0x4a   : > { %s1448_s8 = scalar_lea.vmem %s1776_s5, 256  ;;  %s1542_s15 = smov [#allocation8]  }
  0x4b   : > { %v341_v13 = vld [vmem:[#allocation2] sm:$0xf]  ;;  %p1449_p1 = scmp.ne.s32.totalorder %s1776_s5, %s1448_s8  ;;  %s1452_s18 = sshll.u32 %s1542_s15, 4  ;;  %s1453_s18 = int_to_ptr.vmem [resolvable:$false] %s1452_s18 }
  0x4c   : > { %v428_v14 = vld [vmem:[#allocation2] sm:$0xe]  ;;  %s1454_s4 = scalar_lea.vmem %s1453_s18, 512  ;;  %p1455_p0 = scmp.lt.s32.totalorder %s1776_s5, %s1453_s18 }
  0x4d   : > { %v1368_v16 = vld [vmem:[#allocation2 + $0x8] ss:$0 sps:$4 sm:$0x11]   ;;  %v584_v22 = vld [vmem:[#allocation2] sm:$0xc]  ;;  %p1450_p8 = pnand %p1449_p1, %p1655_p13  ;;  %p1456_p2 = scmp.lt.s32.totalorder %s1454_s4, %s1448_s8 }
  0x4e   : > { %v1363_v17 = vld [vmem:[#allocation2] sm:$0xff]   ;;  %v366_v20 = vshll.u32 %v1368_v16, 16  ;;  %v439_v23 = vrot.slane %v1368_v16, 1  ;;  %v1374_v24 = vld [vmem:[#allocation2 + $0x8] ss:$0 sps:$4 sm:$0x33]  }
  0x4f   : > { %v1712_v18 = vld [vmem:[#allocation2 + $0x4] sm:$0xf]  ;;  %1212 = vmatmul.mubr.msk.bf16.vlgmr.msra.gmra.mxu0 %vm294_vm7, %v1363_v17  ;;  %v518_v31 = vshrl.u32 %v1374_v24, 16  ;;  %v521_v32 = vshll.u32 %v1374_v24, 16  ;;  %v595_v49 = vrot.slane %v1374_v24, 2  ;;  %v1384_v24 = vld [vmem:[#allocation6 + $0x70] sm:$0xff]   ;;  %p1451_p10 = pneg %p1450_p8  ;;  %p1457_p3 = por %p1456_p2, %p1455_p0 }
  0x50   : > { %v1140_v19 = vcombine.low %v341_v13, %v1712_v18  ;;  %v1145_v21 = vcombine.low %v428_v14, %v1712_v18  ;;  %1224 = vmatpush3.bf16.msra.mxu0 %v1364_v15  ;;  %1227 = vmatprep.mubr.msk.bf16.mxu0 %vm1540_vm2, %v1538_v0  ;;  %v368_v34 = vrot.slane %v366_v20, 1  ;;  %v1153_v38 = vcombine.low %v584_v22, %v1712_v18  ;;  %v1722_v39 = vld [vmem:[#allocation2 + $0x8] ss:$0 sps:$4 sm:$0x77]   ;;  %v740_v56 = vld [vmem:[#allocation2] sm:$0x8] }
  0x51   : > { %1225 = vmatprep.subr.bf16.mxu0 %v1538_v0  ;;  %v520_v43 = vrot.slane %v518_v31, 1  ;;  %v523_v44 = vrot.slane %v521_v32, 2  ;;  %v674_v54 = vshrl.u32 %v1722_v39, 16  ;;  %v677_v55 = vshll.u32 %v1722_v39, 16  ;;  %v1731_v57 = vld [vmem:[#allocation2 + $0x8] sm:$0xf]  ;;  %p1458_p5 = pnand %p1457_p3, %p1451_p10 }
  0x52   : > { %v359_v26 = vshrl.u32 %v1140_v19, 16  ;;  %v361_v27 = vshll.u32 %v1140_v19, 16  ;;  %v438_v28 = vrot.slane %v1145_v21, 1  ;;  %v510_v29 = vshrl.u32 %v1145_v21, 16  ;;  %v1381_v19 = vld [vmem:[#allocation6 + $0x78] sm:$0xff]   ;;  %v1383_v20 = vld [vmem:[#allocation6 + $0x88] sm:$0xff]  }
  0x53   : > { %v513_v30 = vshll.u32 %v1145_v21, 16  ;;  %v594_v48 = vrot.slane %v1153_v38, 2  ;;  %v666_v50 = vshrl.u32 %v1153_v38, 16  ;;  %v669_v51 = vshll.u32 %v1153_v38, 16 }
  0x54   : > { %v363_v33 = vrot.slane %v361_v27, 1  ;;  %v440_v36 = vsel %vm437_vm8, %v438_v28, %v439_v23  ;;  %v512_v37 = vrot.slane %v510_v29, 1  ;;  %1226 = vmatpush3.bf16.msra.mxu0 %v1366_v25  ;;  %v524_v53 = vor.u32 %v523_v44, %v520_v43  ;;  %v1385_v25 = vld [vmem:[#allocation6 + $0x80] sm:$0xff]  }
  0x55   : > { %v515_v42 = vrot.slane %v513_v30, 2  ;;  %1239 = vmatprep.subr.bf16.mxu0 %v1538_v0  ;;  %v596_v58 = vsel %vm593_vm10, %v594_v48, %v595_v49  ;;  %v668_v59 = vrot.slane %v666_v50, 2  ;;  %v671_v60 = vrot.slane %v669_v51, 3 }
  0x56   : > { %v364_v40 = vor.u32 %v363_v33, %v359_v26  ;;  %v1161_v61 = vcombine.low %v740_v56, %v1712_v18  ;;  %v676_v2 = vrot.slane %v674_v54, 2  ;;  %v679_v3 = vrot.slane %v677_v55, 3 }
  0x57   : > { %1228 = vmatmul.mubr.msk.bf16.vlgmr.msra.gmra.mxu0 %vm294_vm7, %v440_v36  ;;  %v516_v52 = vor.u32 %v515_v42, %v512_v37  ;;  %v1165_v4 = vcombine.low %v1731_v57, %v1731_v57  ;;  %v672_v5 = vor.u32 %v671_v60, %v668_v59  ;;  %v751_v7 = vrot.slane %v1722_v39, 3 }
  0x58   : > { %v369_v45 = vsel %vm357_vm9, %v364_v40, %v368_v34  ;;  %1240 = vmatpush3.bf16.msra.mxu0 %v1371_v41  ;;  %1243 = vmatprep.mubr.msk.bf16.mxu0 %vm1540_vm2, %v1538_v0  ;;  %v750_v6 = vrot.slane %v1161_v61, 3  ;;  %v822_v8 = vshrl.u32 %v1161_v61, 16  ;;  %v680_v11 = vor.u32 %v679_v3, %v676_v2 }
  0x59   : > { %1220 = vmatmul.mubr.msk.bf16.vlgmr.msra.gmra.mxu1 %vm294_vm7, %v369_v45  ;;  %1241 = vmatprep.subr.bf16.mxu0 %v1538_v0  ;;  %v525_v62 = vsel %vm508_vm11, %v516_v52, %v524_v53  ;;  %v825_v12 = vshll.u32 %v1161_v61, 16  ;;  %v830_v13 = vshrl.u32 %v1165_v4, 16  ;;  %v833_v14 = vshll.u32 %v1165_v4, 16 }
  0x5a   : > { %1232 = vmatpush3.bf16.msra.mxu1 %v1369_v35  ;;  %1235 = vmatprep.mubr.msk.bf16.mxu1 %vm1540_vm2, %v1538_v0  ;;  %v752_v15 = vsel %vm749_vm12, %v750_v6, %v751_v7  ;;  %v824_v16 = vrot.slane %v822_v8, 3  ;;  %v681_v17 = vsel %vm664_vm13, %v672_v5, %v680_v11  ;;  %v1169_v28 = vcombine.low %v1712_v18, %v1731_v57 }
  0x5b   : > { %1233 = vmatprep.subr.bf16.mxu1 %v1538_v0  ;;  %v827_v21 = vrot.slane %v825_v12, 4  ;;  %v832_v22 = vrot.slane %v830_v13, 3  ;;  %v835_v23 = vrot.slane %v833_v14, 4 }
  0x5c   : > { %1242 = vmatpush3.bf16.msra.mxu0 %v1373_v47 }
  0x5d   : > { %1255 = vmatprep.subr.bf16.mxu0 %v1538_v0  ;;  %v828_v26 = vor.u32 %v827_v21, %v824_v16  ;;  %v836_v27 = vor.u32 %v835_v23, %v832_v22 }
  0x5e   : > { %1234 = vmatpush3.bf16.msra.mxu1 %v1372_v46 }
  0x5f   : > { %1247 = vmatprep.subr.bf16.mxu1 %v1538_v0  ;;  %1244 = vmatmul.mubr.msk.bf16.vlgmr.msra.gmra.mxu0 %vm294_vm7, %v596_v58  ;;  %v837_v29 = vsel %vm820_vm14, %v828_v26, %v836_v27 }
  0x60   : > { %1256 = vmatpush3.bf16.msra.mxu0 %v1377_v1  ;;  %1259 = vmatprep.mubr.msk.bf16.mxu0 %vm1540_vm2, %v1538_v0 }
  0x61   : > { %1236 = vmatmul.mubr.msk.bf16.vlgmr.msra.gmra.mxu1 %vm294_vm7, %v525_v62  ;;  %1257 = vmatprep.subr.bf16.mxu0 %v1538_v0 }
  0x62   : > { %1248 = vmatpush3.bf16.msra.mxu1 %v1375_v63  ;;  %1251 = vmatprep.mubr.msk.bf16.mxu1 %vm1540_vm2, %v1538_v0 }
  0x63   : > { %1249 = vmatprep.subr.bf16.mxu1 %v1538_v0 }
  0x64   : > { %1258 = vmatpush3.bf16.msra.mxu0 %v1379_v10 }
  0x65   : > { %1271 = vmatprep.subr.bf16.mxu0 %v1538_v0 }
  0x66   : > { %1250 = vmatpush3.bf16.msra.mxu1 %v1378_v9 }
  0x67   : > { %1263 = vmatprep.subr.bf16.mxu1 %v1538_v0  ;;  %1260 = vmatmul.mubr.msk.bf16.vlgmr.msra.gmra.mxu0 %vm294_vm7, %v752_v15 }
  0x68   : > { %1272 = vmatpush3.bf16.msra.mxu0 %v1383_v20  ;;  %1275 = vmatprep.mubr.msk.bf16.mxu0 %vm1540_vm2, %v1538_v0 }
  0x69   : > { %1252 = vmatmul.mubr.msk.bf16.vlgmr.msra.gmra.mxu1 %vm294_vm7, %v681_v17  ;;  %1273 = vmatprep.subr.bf16.mxu0 %v1538_v0 }
  0x6a   : > { %1264 = vmatpush3.bf16.msra.mxu1 %v1381_v19  ;;  %1267 = vmatprep.mubr.msk.bf16.mxu1 %vm1540_vm2, %v1538_v0 }
  0x6b   : > { %1265 = vmatprep.subr.bf16.mxu1 %v1538_v0  ;;  %v1135_v0 = vld [vmem:[%s1833_s2] ss:$0 sm:$0xff] }
  0x6c   : > { %1274 = vmatpush3.bf16.msra.mxu0 %v1385_v25 }
  0x6e   : > { %1266 = vmatpush3.bf16.msra.mxu1 %v1384_v24 }
  0x6f   : > { %1276 = vmatmul.mubr.msk.bf16.vlgmr.msra.gmra.mxu0 %vm294_vm7, %v1169_v28 }
  0x71   : > { %1268 = vmatmul.mubr.msk.bf16.vlgmr.msra.gmra.mxu1 %vm294_vm7, %v837_v29 }
 0x10f   : > { %v332_v30 = vpop.f32.mrf.mxu0 }
 0x110   : > { %v339_v39 = vadd.f32 %v1135_v0, %v332_v30 }
 0x111   : > { %v1213_v31 = vpop.f32.mrf.mxu0 }
 0x113   : > { %v335_v32 = vpop.f32.mrf.mxu0 }
 0x114   : > { %v340_v45 = vadd.f32 %v1135_v0, %v335_v32 }
 0x115   : > { %v1214_v33 = vpop.f32.mrf.mxu0 }
 0x117   : > { %v490_v35 = vpop.f32.mrf.mxu0 }
 0x119   : > { %v419_v34 = vpop.f32.mrf.mxu1  ;;  %v1229_v37 = vpop.f32.mrf.mxu0 }
 0x11a   : > { %v426_v42 = vadd.f32 %v419_v34, %v339_v39 }
 0x11b   : > { %v1221_v36 = vpop.f32.mrf.mxu1  ;;  %v493_v38 = vpop.f32.mrf.mxu0 }
 0x11c   : > { %v497_v48 = vadd.f32 %v490_v35, %v426_v42 }
 0x11d   : > { %v422_v18 = vpop.f32.mrf.mxu1  ;;  %v1230_v41 = vpop.f32.mrf.mxu0 }
 0x11e   : > { %v427_v49 = vadd.f32 %v422_v18, %v340_v45 }
 0x11f   : > { %v1222_v40 = vpop.f32.mrf.mxu1  ;;  %v646_v44 = vpop.f32.mrf.mxu0 }
 0x120   : > { %v498_v55 = vadd.f32 %v493_v38, %v427_v49 }
 0x121   : > { %v575_v43 = vpop.f32.mrf.mxu1  ;;  %v1245_v47 = vpop.f32.mrf.mxu0 }
 0x122   : > { %v582_v52 = vadd.f32 %v575_v43, %v497_v48 }
 0x123   : > { %v1237_v46 = vpop.f32.mrf.mxu1  ;;  %v649_v51 = vpop.f32.mrf.mxu0 }
 0x124   : > { %v653_v58 = vadd.f32 %v646_v44, %v582_v52 }
 0x125   : > { %v578_v50 = vpop.f32.mrf.mxu1  ;;  %v1246_v54 = vpop.f32.mrf.mxu0 }
 0x126   : > { %v583_v59 = vadd.f32 %v578_v50, %v498_v55 }
 0x127   : > { %v1238_v53 = vpop.f32.mrf.mxu1  ;;  %v802_v57 = vpop.f32.mrf.mxu0 }
 0x128   : > { %v654_v2 = vadd.f32 %v649_v51, %v583_v59 }
 0x129   : > { %v731_v56 = vpop.f32.mrf.mxu1  ;;  %v1261_v61 = vpop.f32.mrf.mxu0 }
 0x12a   : > { %v738_v62 = vadd.f32 %v731_v56, %v653_v58 }
 0x12b   : > { %v1253_v60 = vpop.f32.mrf.mxu1  ;;  %v805_v1 = vpop.f32.mrf.mxu0 }
 0x12c   : > { %v809_v5 = vadd.f32 %v802_v57, %v738_v62 }
 0x12d   : > { %v734_v63 = vpop.f32.mrf.mxu1  ;;  %v1262_v4 = vpop.f32.mrf.mxu0 }
 0x12e   : > { %v739_v6 = vadd.f32 %v734_v63, %v654_v2 }
 0x12f   : > { %v1254_v3 = vpop.f32.mrf.mxu1  ;;  %v951_v8 = vpop.f32.mrf.mxu0 }
 0x130   : > { %v810_v12 = vadd.f32 %v805_v1, %v739_v6 }
 0x131   : > { %v887_v7 = vpop.f32.mrf.mxu1  ;;  %v1277_v11 = vpop.f32.mrf.mxu0 }
 0x132   : > { %v894_v9 = vadd.f32 %v887_v7, %v809_v5 }
 0x133   : > { %v1269_v10 = vpop.f32.mrf.mxu1  ;;  %v954_v14 = vpop.f32.mrf.mxu0 }
 0x134   : > { %v958_v15 = vadd.f32 %v951_v8, %v894_v9 }
 0x135   : > { %v890_v13 = vpop.f32.mrf.mxu1  ;;  %v1278_v19 = vpop.f32.mrf.mxu0 }
 0x136   : > { %v895_v16 = vadd.f32 %v890_v13, %v810_v12  ;;  %v961_v21 = vsel %vm960_vm15, %v958_v15, -inf }
 0x137   : > { %v1270_v17 = vpop.f32.mrf.mxu1 }
 0x138   : > { %v959_v20 = vadd.f32 %v954_v14, %v895_v16 }
 0x13a   : > { %v962_v22 = vsel %vm960_vm15, %v959_v20, -inf }
 0x13b   : > { %v963_v23 = vmax.f32 %v961_v21, %v962_v22 }
 0x13d   : > { %v964_v24 = vrot.slane %v963_v23, 4 }
 0x13f   : > { %v965_v25 = vmax.f32 %v963_v23, %v964_v24 }
 0x141   : > { %v966_v26 = vrot.slane %v965_v25, 2 }
 0x143   : > { %v967_v27 = vmax.f32 %v965_v25, %v966_v26 }
 0x145   : > { %v968_v28 = vrot.slane %v967_v27, 1 }
 0x147   : > { %v969_v29 = vmax.f32 %v967_v27, %v968_v28 }
 0x149   : > { %v970_v30 = vsub.f32 %v958_v15, %v969_v29  ;;  %v971_v31 = vsub.f32 %v959_v20, %v969_v29 }
 0x14b   : > { %v972_v32 = vmul.f32 1.442695, %v970_v30  ;;  %v974_v33 = vmul.f32 1.442695, %v971_v31 }
 0x14d   : > { %1388 = vpow2.f32 %v972_v32 }
 0x14e   : > { %1390 = vpow2.f32 %v974_v33 }
 0x15a   : > { %v1389_v34 = vpop.eup %1388 }
 0x15b   : > { %v1391_v35 = vpop.eup %1390  ;;  %v976_v0 = vsel %vm960_vm15, %v1389_v34, 0.0 }
 0x15c   : > { %v977_v36 = vsel %vm960_vm15, %v1391_v35, 0.0 }
 0x15d   : > { %v978_v37 = vadd.f32 %v977_v36, %v976_v0 }
 0x15f   : > { %v979_v18 = vrot.slane %v978_v37, 4 }
 0x161   : > { %v980_v38 = vadd.f32 %v979_v18, %v978_v37 }
 0x163   : > { %v981_v39 = vrot.slane %v980_v38, 2 }
 0x165   : > { %v982_v40 = vadd.f32 %v981_v39, %v980_v38 }
 0x167   : > { %v983_v41 = vrot.slane %v982_v40, 1 }
 0x169   : > { %v984_v42 = vadd.f32 %v983_v41, %v982_v40 }
 0x16b   : > { %1392 = vrcp.f32 %v984_v42 }
 0x178   : > { %v1393_v43 = vpop.eup %1392 }
 0x179   : > { %v986_v44 = vmul.f32 %v1393_v43, %v1389_v34  ;;  %v987_v45 = vmul.f32 %v1393_v43, %v1391_v35 }
 0x17b   : > { %990 = vrot.lane.b32.xlu0 %v986_v44, %s1541_s24 }
 0x17f   : > { %992 = vrot.lane.b32.xlu0 %v987_v45, %s1541_s24 }
 0x1ed   : > { %v991_v46 = vpop.permute.xlu0 %990 }
 0x1ee   : > { %v996_v47 = vmul.f32 %v991_v46, %v958_v15 }
 0x1f0   : > { %998 = vst.msk [vmem:[%s236_s29] sm:$0xff] %vm294_vm7, %v996_v47 }
 0x1f1   : > { %v993_v48 = vpop.permute.xlu0 %992 }
 0x1f2   : > { %v997_v49 = vmul.f32 %v993_v48, %v959_v20 }
 0x1f4   : > { %999 = vst.msk [vmem:[%s236_s29 + $0x8] sm:$0xff] %vm294_vm7, %v997_v49 }
 0x1f5   : > { %1461 = shalt.err (!%p1458_p5)
}
 0x1f6   : > { %s1462_s26 = scalar_lea.hbm %s1782_s7, 256  ;;  %s1466_s22 = scalar_lea.hbm %s1834_s3, 512 }
 0x1f7   : > { %p1463_p7 = scmp.ne.s32.totalorder %s1782_s7, %s1462_s26  ;;  %p1467_p9 = scmp.lt.s32.totalorder %s1782_s7, %s1834_s3 }
 0x1f8   : > { %p1468_p11 = scmp.lt.s32.totalorder %s1466_s22, %s1462_s26 }
 0x1f9   : > { %p1464_p4 = pnand %p1463_p7, %p1655_p13 }
 0x1fa   : > { %p1469_p12 = por %p1468_p11, %p1467_p9 }
 0x1fb   : > { %p1465_p6 = pneg %p1464_p4 }
 0x1fd   : > { %p1470_p1 = pnand %p1469_p12, %p1465_p6 }
 0x1ff   : > { %1473 = shalt.err (!%p1470_p1)
}
 0x200   : > { %s1543_s29 = smov 128   ;;  %s1544_s6 = smov 8  }
 0x201   : > { %1285 = dma.vmem_to_hbm [thread:$0]  (%p1655_p13), %s1776_s5, 256, %s1782_s7, %s1001_s25, %s1543_s29, %s1543_s29, %s1544_s6  }
 0x202 PF: > { %s1030_s21 = sand.u32 1, %s1512_s12   ;;  %p1850_p8 = scmp.ne.s32.totalorder %s1841_s23, 0 }
 0x203   : > { %p1851_p10 = scmp.ge.s32.totalorder %s1532_s17, 2  ;;  %s1031_s10 = scalar_lea.sflag [#allocation5], %s1030_s21 }
 0x205   : > { %p1296_p0 = pnand %p1851_p10, %p1850_p8 }
 0x207   : > { %p1297_p2 = pneg %p1296_p0 }
 0x209   : > { %1507 = dma.done.wait (%p1297_p2), %s1031_s10, 256  }
 0x20a   : > { %1509 = vsyncadd (%p1297_p2), %s1031_s10, 4294967040  ;;  %s20_s17 = sadd.s32 1, %s1532_s17   ;;  %s1852_s12 = smov %s1516_s13 }
 0x20b   : > { %p17_p3 = scmp.ge.s32.totalorder %s20_s17, 4   ;;  %s1853_s13 = smov %s1520_s14 }
 0x20c   : > { %s1854_s14 = smov %s1664_s19  ;;  %s1855_s15 = smov %s1528_s16 }
 0x20d   : > { %s1856_s16 = smov %s1858_s28  ;;  %19 = sbr.rel (!%p17_p3) target bundleno = 7 (0x7), region = 93 }
 0x212   :  { %1036 = vsyncpa [#allocation4], 1 }
 0x213   :  { %1038 = vsyncpa [#allocation4 + $0x1], 1 }
 0x214   :  { %1039 = vsyncpa [#allocation7], 1 }
 0x215   :  { %1040 = vsyncpa [#allocation5], 1 }
 0x216   :  { %1042 = vsyncpa [#allocation5 + $0x1], 1 }

// kernel: tpu_custom_call.1
= control target key start
LH: loop header
LB: loop body
LE: loop exit
PB: predicated region body
PF: predicated region fallthrough
CT: control target
= control target key end

     0   :  { %8 = vsyncpa [#allocation4], 0  ;;  %s1831_s0 = inlined_call_operand.hbm [shape: bf16[2,16,32], index: 0, kind: input, shape index: {}]   ;;  %s1832_s1 = inlined_call_operand.hbm [shape: bf16[1,9,32,64], index: 1, kind: input, shape index: {}]   ;;  %s1833_s2 = inlined_call_operand.vmem [shape: f32[1,64], index: 2, kind: input, shape index: {}]   ;;  %s1834_s3 = inlined_call_operand.hbm [shape: f32[2,16,32], index: 3, kind: output, shape index: {}]  }
   0x1   :  { %10 = vsyncpa [#allocation4 + $0x1], 0 }
   0x2   :  { %11 = vsyncpa [#allocation7], 0 }
   0x3   :  { %12 = vsyncpa [#allocation5], 0 }
   0x4   :  { %14 = vsyncpa [#allocation5 + $0x1], 0  ;;  %s1565_s12 = smov 0   ;;  %s1567_s13 = smov 0  }
   0x5   :  { %s1569_s14 = smov 0   ;;  %s1571_s15 = smov 0  }
   0x6   :  { %s1573_s16 = smov 0   ;;  %s1575_s17 = smov 0  }
   0x7 LB: > { %s1122_s18 = sadd.s32 4294967295, %s1532_s17   ;;  %s1123_s19 = sadd.s32 4294967294, %s1532_s17   ;;  %s1532_s17 = sphi %s1575_s17, %s20_s17   ;;  %s1528_s16 = sphi %s1573_s16, %s1856_s16   ;;  %s1524_s15 = sphi %s1571_s15, %s1855_s15   ;;  %s1520_s14 = sphi %s1569_s14, %s1854_s14   ;;  %s1516_s13 = sphi %s1567_s13, %s1853_s13   ;;  %s1512_s12 = sphi %s1565_s12, %s1852_s12  }
   0x8   : > { %p52_p0 = scmp.ne.s32.totalorder %s1516_s13, %s1512_s12  ;;  %p1599_p1 = scmp.eq.s32.totalorder %s1122_s18, 0 }
   0x9   : > { %p1603_p2 = scmp.eq.s32.totalorder %s1122_s18, 1  ;;  %p136_p3 = scmp.eq.s32.totalorder %s1123_s19, 1 }
   0xa   : > { %p1609_p4 = por %p1599_p1, %p52_p0  ;;  %p1124_p5 = scmp.ge.s32.totalorder %s1532_s17, 1 }
   0xb   : > { %p1614_p6 = por %p136_p3, %p52_p0  ;;  %p143_p7 = scmp.lt.s32.totalorder %s1532_s17, 3 }
   0xc   : > { %s1840_s22 = scalar_select %p1609_p4, 1, 0 }
   0xd   : > { %s1841_s23 = scalar_select %p1614_p6, 1, 0 }
   0xe   : > { %p1619_p8 = pnand %p1124_p5, %p143_p7  ;;  %s1534_s25 = smov [#allocation6]  }
   0xf   : > { %s158_s26 = sshll.u32 %s1534_s25, 4  ;;  %s29_s28 = sadd.s32 1, %s1528_s16  ;;  %s159_s26 = int_to_ptr.vmem [resolvable:$true] %s158_s26 }
  0x10   : > { %p1287_p9 = pneg %p1619_p8  ;;  %s1405_s29 = scalar_lea.vmem %s159_s26, 2304 }
  0x11   : > { %p1406_p13 = scmp.ne.s32.totalorder %s159_s26, %s1405_s29  ;;  %p1413_p5 = scmp.lt.s32.totalorder %s159_s26, %s159_s26 }
  0x12   : > { %p1628_p11 = pnand %p1287_p9, %p1599_p1  ;;  %p1414_p7 = scmp.lt.s32.totalorder %s1405_s29, %s1405_s29 }
  0x14   : > { %p1396_p12 = pneg %p1628_p11  ;;  %p1415_p6 = por %p1414_p7, %p1413_p5 }
  0x16   : > { %p1408_p0 = pnand %p1406_p13, %p1396_p12 }
  0x18   : > { %p1409_p3 = pneg %p1408_p0 }
  0x1a   : > { %p1416_p4 = pnand %p1415_p6, %p1409_p3 }
  0x1c   : > { %1419 = shalt.err (!%p1416_p4)
}
  0x1d   : > { %s1836_s30 = smov 64   ;;  %s1837_s4 = smov 4  }
  0x1e   : > { %1290 = dma.hbm_to_vmem [thread:$0]  (!%p1628_p11), %s1832_s1, 2304, %s159_s26, [#allocation7], %s1836_s30, %s1836_s30, %s1837_s4  }
  0x1f   : > { %p30_p4 = scmp.ge.s32.totalorder %s29_s28, 2  ;;  %s39_s7 = sadd.s32 1, %s1520_s14 }
  0x20   : > { %p46_p6 = scmp.ne.s32.totalorder %s1520_s14, %s1516_s13  ;;  %p47_p9 = scmp.eq.s32.totalorder %s1532_s17, 0 }
  0x21   : > { %s1858_s28 = smov (%p30_p4, %s29_s28), 0  ;;  %p1300_p0 = scmp.lt.s32.totalorder %s1532_s17, 2 }
  0x22   : > { %p1649_p12 = por %p47_p9, %p46_p6  ;;  %p1655_p13 = por %p1603_p2, %p46_p6 }
  0x23   : > { %s36_s10 = ssub.s32 %s1528_s16, %s1858_s28  ;;  %s178_s11 = sand.u32 1, %s1520_s14  }
  0x24   : > { %p37_p11 = scmp.eq.s32.totalorder %s36_s10, 0  ;;  %s1128_s18 = sshll.u32 %s178_s11, 3 }
  0x25   : > { %s1178_s25 = sshll.u32 %s1528_s16, 7  ;;  %s182_s5 = scalar_lea.vmem [#allocation3], %s1128_s18 }
  0x26   : > { %s1664_s19 = scalar_select %p37_p11, %s1520_s14, %s39_s7  }
  0x27   : > { %s188_s29 = scalar_lea.hbm %s1831_s0, %s1178_s25  ;;  %s189_s6 = sshll.u32 %s182_s5, 4  ;;  %s190_s6 = int_to_ptr.vmem [resolvable:$true] %s189_s6 }
  0x28   : > { %p1672_p2 = pnand %p1300_p0, %p1649_p12  ;;  %s179_s30 = scalar_lea.sflag [#allocation4], %s178_s11 }
  0x29   : > { %s1433_s10 = scalar_lea.vmem %s190_s6, 128  ;;  %s1537_s7 = smov [#allocation3]  }
  0x2a   : > { %p1422_p3 = pneg %p1672_p2  ;;  %p1434_p5 = scmp.ne.s32.totalorder %s190_s6, %s1433_s10 }
  0x2b   : > { %s1438_s4 = sshll.u32 %s1537_s7, 4  ;;  %s1439_s4 = int_to_ptr.vmem [resolvable:$false] %s1438_s4 }
  0x2c   : > { %p1436_p7 = pnand %p1434_p5, %p1422_p3  ;;  %s1440_s25 = scalar_lea.vmem %s1439_s4, 256 }
  0x2d   : > { %p1441_p6 = scmp.lt.s32.totalorder %s190_s6, %s1439_s4  ;;  %p1442_p9 = scmp.lt.s32.totalorder %s1440_s25, %s1433_s10 }
  0x2e   : > { %p1437_p4 = pneg %p1436_p7 }
  0x2f   : > { %p1443_p11 = por %p1442_p9, %p1441_p6 }
  0x31   : > { %p1444_p10 = pnand %p1443_p11, %p1437_p4 }
  0x33   : > { %1447 = shalt.err (!%p1444_p10)
}
  0x34   : > { %s1847_s8 = smov 4   ;;  %s1848_s18 = smov 64  }
  0x35   : > { %1294 = dma.hbm_to_vmem [thread:$0]  (!%p1672_p2), %s188_s29, 128, %s190_s6, %s179_s30, %s1848_s18, %s1848_s18, %s1847_s8  }
  0x36   : > { %201 = sbr.rel (%p1619_p8) target bundleno = 514 (0x202), region = 32  ;;  %s1686_s11 = sand.u32 (!%p1619_p8), 1, %s1516_s13  }
  0x37   : > { %s1132_s4 = sshll.u32 (!%p1619_p8), %s1686_s11, 3  ;;  %s204_s26 = scalar_lea.sflag (!%p1619_p8), [#allocation4], %s1686_s11 }
  0x38   : > { %s207_s27 = scalar_lea.vmem (!%p1619_p8), [#allocation3], %s1132_s4  ;;  %p1849_p12 = scmp.ne.s32.totalorder (!%p1619_p8), %s1840_s22, 0 }
  0x3b   : > { %1499 = dma.done.wait (%p1849_p12), %s204_s26, 128  }
  0x3c   : > { %1501 = vsyncadd (%p1849_p12), %s204_s26, 4294967168 }
  0x3d   : > { %1503 = dma.done.wait (%p1599_p1), [#allocation7], 2304  }
  0x3e   : > { %1505 = vsyncadd (%p1599_p1), [#allocation7], 4294964992  ;;  %vm241_vm0 = vcmask 254976   ;;  %v1538_v0 = vmov 0.0   ;;  %v1539_v1 = vmov 0   ;;  %vm243_vm1 = vcmask 257026  }
  0x3f   : > { %1207 = vmatprep.subr.bf16.mxu0 %v1538_v0  ;;  %1215 = vmatprep.subr.bf16.mxu1 %v1538_v0  ;;  %242 = vst.msk [vmem:[#allocation2] sm:$0x3] %vm241_vm0, %v1539_v1  ;;  %vm1540_vm2 = vmmov 0   ;;  %v1360_v2 = vld [vmem:[#allocation6 + $0x8] sm:$0xff]   ;;  %vm249_vm3 = vcmask 1041408   ;;  %v1361_v3 = vld [vmem:[#allocation6] sm:$0xff]  }
  0x40   : > { %1211 = vmatprep.mubr.msk.bf16.mxu0 %vm1540_vm2, %v1538_v0  ;;  %244 = vst.msk [vmem:[#allocation2 + $0x8] sm:$0xc] %vm243_vm1, %v1539_v1  ;;  %1219 = vmatprep.mubr.msk.bf16.mxu1 %vm1540_vm2, %v1538_v0  ;;  %vm250_vm4 = vcmask 1045508   ;;  %v1362_v4 = vld [vmem:[#allocation6 + $0x18] sm:$0xff]   ;;  %v1365_v9 = vld [vmem:[#allocation6 + $0x10] sm:$0xff]   ;;  %vm261_vm6 = vcmask 257024  }
  0x41   : > { %1208 = vmatpush3.bf16.msra.mxu0 %v1360_v2  ;;  %v245_v5 = vld [vmem:[%s207_s27] sm:$0xf]  ;;  %v246_v6 = vld [vmem:[%s207_s27 + $0x4] sm:$0xf]  ;;  %1216 = vmatpush3.bf16.msra.mxu1 %v1362_v4  ;;  %vm251_vm5 = vmor %vm249_vm3, %vm250_vm4  ;;  %vm294_vm7 = vcmask 261120   ;;  %vm437_vm8 = vcmask 1046528  }
  0x42   : > { %1209 = vmatprep.subr.bf16.mxu0 %v1538_v0  ;;  %v252_v7 = vrot.slane %v245_v5, 6  ;;  %v254_v8 = vrot.slane %v246_v6, 6  ;;  %1217 = vmatprep.subr.bf16.mxu1 %v1538_v0  ;;  %v1364_v15 = vld [vmem:[#allocation6 + $0x28] sm:$0xff]   ;;  %v1366_v25 = vld [vmem:[#allocation6 + $0x20] sm:$0xff]   ;;  %vm357_vm9 = vsmask.f32 7424 }
  0x43   : > { %v1369_v35 = vld [vmem:[#allocation6 + $0x38] sm:$0xff]   ;;  %v1371_v41 = vld [vmem:[#allocation6 + $0x48] sm:$0xff]   ;;  %v1372_v46 = vld [vmem:[#allocation6 + $0x30] sm:$0xff]   ;;  %vm593_vm10 = vcmask 1045504   ;;  %vm508_vm11 = vsmask.f32 6400 }
  0x44   : > { %v253_v10 = vrot.slane %v252_v7, 4  ;;  %260 = vst.msk [vmem:[#allocation2] sm:$0xc] %vm243_vm1, %v252_v7  ;;  %v256_v11 = vrot.slane %v254_v8, 4  ;;  %v1373_v47 = vld [vmem:[#allocation6 + $0x40] sm:$0xff]   ;;  %v1375_v63 = vld [vmem:[#allocation6 + $0x58] sm:$0xff]  }
  0x45   : > { %1210 = vmatpush3.bf16.msra.mxu0 %v1361_v3  ;;  %1218 = vmatpush3.bf16.msra.mxu1 %v1365_v9  ;;  %v1377_v1 = vld [vmem:[#allocation6 + $0x68] sm:$0xff]   ;;  %vm749_vm12 = vcmask 1044480   ;;  %v1378_v9 = vld [vmem:[#allocation6 + $0x50] sm:$0xff]   ;;  %vm664_vm13 = vsmask.f32 5376  ;;  %vm960_vm15 = vcmask 523520  }
  0x46   : > { %1223 = vmatprep.subr.bf16.mxu0 %v1538_v0  ;;  %v255_v12 = vsel %vm251_vm5, %v253_v10, %v254_v8  ;;  %263 = vst.msk [vmem:[#allocation2 + $0x8] sm:$0x3] %vm241_vm0, %v256_v11  ;;  %1231 = vmatprep.subr.bf16.mxu1 %v1538_v0  ;;  %v1379_v10 = vld [vmem:[#allocation6 + $0x60] sm:$0xff]   ;;  %vm820_vm14 = vsmask.f32 4352  ;;  %s1541_s24 = smov 96  }
  0x47   : > { %262 = vst.msk [vmem:[#allocation2 + $0x4] sm:$0xf] %vm261_vm6, %v255_v12  ;;  %s1134_s30 = sshll.u32 %s1686_s11, 4  ;;  %s1179_s6 = sshll.u32 %s1524_s15, 8 }
  0x48   : > { %s236_s29 = scalar_lea.vmem [#allocation8], %s1134_s30  ;;  %s1782_s7 = scalar_lea.hbm %s1834_s3, %s1179_s6 }
  0x49   : > { %s1015_s5 = sshll.u32 %s236_s29, 4  ;;  %s1001_s25 = scalar_lea.sflag [#allocation5], %s1686_s11  ;;  %s1776_s5 = int_to_ptr.vmem [resolvable:$true] %s1015_s5 }
  0x4a   : > { %s1448_s8 = scalar_lea.vmem %s1776_s5, 256  ;;  %s1542_s15 = smov [#allocation8]  }
  0x4b   : > { %v341_v13 = vld [vmem:[#allocation2] sm:$0xf]  ;;  %p1449_p1 = scmp.ne.s32.totalorder %s1776_s5, %s1448_s8  ;;  %s1452_s18 = sshll.u32 %s1542_s15, 4  ;;  %s1453_s18 = int_to_ptr.vmem [resolvable:$false] %s1452_s18 }
  0x4c   : > { %v428_v14 = vld [vmem:[#allocation2] sm:$0xe]  ;;  %s1454_s4 = scalar_lea.vmem %s1453_s18, 512  ;;  %p1455_p0 = scmp.lt.s32.totalorder %s1776_s5, %s1453_s18 }
  0x4d   : > { %v1368_v16 = vld [vmem:[#allocation2 + $0x8] ss:$0 sps:$4 sm:$0x11]   ;;  %v584_v22 = vld [vmem:[#allocation2] sm:$0xc]  ;;  %p1450_p8 = pnand %p1449_p1, %p1655_p13  ;;  %p1456_p2 = scmp.lt.s32.totalorder %s1454_s4, %s1448_s8 }
  0x4e   : > { %v1363_v17 = vld [vmem:[#allocation2] sm:$0xff]   ;;  %v366_v20 = vshll.u32 %v1368_v16, 16  ;;  %v439_v23 = vrot.slane %v1368_v16, 1  ;;  %v1374_v24 = vld [vmem:[#allocation2 + $0x8] ss:$0 sps:$4 sm:$0x33]  }
  0x4f   : > { %v1712_v18 = vld [vmem:[#allocation2 + $0x4] sm:$0xf]  ;;  %1212 = vmatmul.mubr.msk.bf16.vlgmr.msra.gmra.mxu0 %vm294_vm7, %v1363_v17  ;;  %v518_v31 = vshrl.u32 %v1374_v24, 16  ;;  %v521_v32 = vshll.u32 %v1374_v24, 16  ;;  %v595_v49 = vrot.slane %v1374_v24, 2  ;;  %v1384_v24 = vld [vmem:[#allocation6 + $0x70] sm:$0xff]   ;;  %p1451_p10 = pneg %p1450_p8  ;;  %p1457_p3 = por %p1456_p2, %p1455_p0 }
  0x50   : > { %v1140_v19 = vcombine.low %v341_v13, %v1712_v18  ;;  %v1145_v21 = vcombine.low %v428_v14, %v1712_v18  ;;  %1224 = vmatpush3.bf16.msra.mxu0 %v1364_v15  ;;  %1227 = vmatprep.mubr.msk.bf16.mxu0 %vm1540_vm2, %v1538_v0  ;;  %v368_v34 = vrot.slane %v366_v20, 1  ;;  %v1153_v38 = vcombine.low %v584_v22, %v1712_v18  ;;  %v1722_v39 = vld [vmem:[#allocation2 + $0x8] ss:$0 sps:$4 sm:$0x77]   ;;  %v740_v56 = vld [vmem:[#allocation2] sm:$0x8] }
  0x51   : > { %1225 = vmatprep.subr.bf16.mxu0 %v1538_v0  ;;  %v520_v43 = vrot.slane %v518_v31, 1  ;;  %v523_v44 = vrot.slane %v521_v32, 2  ;;  %v674_v54 = vshrl.u32 %v1722_v39, 16  ;;  %v677_v55 = vshll.u32 %v1722_v39, 16  ;;  %v1731_v57 = vld [vmem:[#allocation2 + $0x8] sm:$0xf]  ;;  %p1458_p5 = pnand %p1457_p3, %p1451_p10 }
  0x52   : > { %v359_v26 = vshrl.u32 %v1140_v19, 16  ;;  %v361_v27 = vshll.u32 %v1140_v19, 16  ;;  %v438_v28 = vrot.slane %v1145_v21, 1  ;;  %v510_v29 = vshrl.u32 %v1145_v21, 16  ;;  %v1381_v19 = vld [vmem:[#allocation6 + $0x78] sm:$0xff]   ;;  %v1383_v20 = vld [vmem:[#allocation6 + $0x88] sm:$0xff]  }
  0x53   : > { %v513_v30 = vshll.u32 %v1145_v21, 16  ;;  %v594_v48 = vrot.slane %v1153_v38, 2  ;;  %v666_v50 = vshrl.u32 %v1153_v38, 16  ;;  %v669_v51 = vshll.u32 %v1153_v38, 16 }
  0x54   : > { %v363_v33 = vrot.slane %v361_v27, 1  ;;  %v440_v36 = vsel %vm437_vm8, %v438_v28, %v439_v23  ;;  %v512_v37 = vrot.slane %v510_v29, 1  ;;  %1226 = vmatpush3.bf16.msra.mxu0 %v1366_v25  ;;  %v524_v53 = vor.u32 %v523_v44, %v520_v43  ;;  %v1385_v25 = vld [vmem:[#allocation6 + $0x80] sm:$0xff]  }
  0x55   : > { %v515_v42 = vrot.slane %v513_v30, 2  ;;  %1239 = vmatprep.subr.bf16.mxu0 %v1538_v0  ;;  %v596_v58 = vsel %vm593_vm10, %v594_v48, %v595_v49  ;;  %v668_v59 = vrot.slane %v666_v50, 2  ;;  %v671_v60 = vrot.slane %v669_v51, 3 }
  0x56   : > { %v364_v40 = vor.u32 %v363_v33, %v359_v26  ;;  %v1161_v61 = vcombine.low %v740_v56, %v1712_v18  ;;  %v676_v2 = vrot.slane %v674_v54, 2  ;;  %v679_v3 = vrot.slane %v677_v55, 3 }
  0x57   : > { %1228 = vmatmul.mubr.msk.bf16.vlgmr.msra.gmra.mxu0 %vm294_vm7, %v440_v36  ;;  %v516_v52 = vor.u32 %v515_v42, %v512_v37  ;;  %v1165_v4 = vcombine.low %v1731_v57, %v1731_v57  ;;  %v672_v5 = vor.u32 %v671_v60, %v668_v59  ;;  %v751_v7 = vrot.slane %v1722_v39, 3 }
  0x58   : > { %v369_v45 = vsel %vm357_vm9, %v364_v40, %v368_v34  ;;  %1240 = vmatpush3.bf16.msra.mxu0 %v1371_v41  ;;  %1243 = vmatprep.mubr.msk.bf16.mxu0 %vm1540_vm2, %v1538_v0  ;;  %v750_v6 = vrot.slane %v1161_v61, 3  ;;  %v822_v8 = vshrl.u32 %v1161_v61, 16  ;;  %v680_v11 = vor.u32 %v679_v3, %v676_v2 }
  0x59   : > { %1220 = vmatmul.mubr.msk.bf16.vlgmr.msra.gmra.mxu1 %vm294_vm7, %v369_v45  ;;  %1241 = vmatprep.subr.bf16.mxu0 %v1538_v0  ;;  %v525_v62 = vsel %vm508_vm11, %v516_v52, %v524_v53  ;;  %v825_v12 = vshll.u32 %v1161_v61, 16  ;;  %v830_v13 = vshrl.u32 %v1165_v4, 16  ;;  %v833_v14 = vshll.u32 %v1165_v4, 16 }
  0x5a   : > { %1232 = vmatpush3.bf16.msra.mxu1 %v1369_v35  ;;  %1235 = vmatprep.mubr.msk.bf16.mxu1 %vm1540_vm2, %v1538_v0  ;;  %v752_v15 = vsel %vm749_vm12, %v750_v6, %v751_v7  ;;  %v824_v16 = vrot.slane %v822_v8, 3  ;;  %v681_v17 = vsel %vm664_vm13, %v672_v5, %v680_v11  ;;  %v1169_v28 = vcombine.low %v1712_v18, %v1731_v57 }
  0x5b   : > { %1233 = vmatprep.subr.bf16.mxu1 %v1538_v0  ;;  %v827_v21 = vrot.slane %v825_v12, 4  ;;  %v832_v22 = vrot.slane %v830_v13, 3  ;;  %v835_v23 = vrot.slane %v833_v14, 4 }
  0x5c   : > { %1242 = vmatpush3.bf16.msra.mxu0 %v1373_v47 }
  0x5d   : > { %1255 = vmatprep.subr.bf16.mxu0 %v1538_v0  ;;  %v828_v26 = vor.u32 %v827_v21, %v824_v16  ;;  %v836_v27 = vor.u32 %v835_v23, %v832_v22 }
  0x5e   : > { %1234 = vmatpush3.bf16.msra.mxu1 %v1372_v46 }
  0x5f   : > { %1247 = vmatprep.subr.bf16.mxu1 %v1538_v0  ;;  %1244 = vmatmul.mubr.msk.bf16.vlgmr.msra.gmra.mxu0 %vm294_vm7, %v596_v58  ;;  %v837_v29 = vsel %vm820_vm14, %v828_v26, %v836_v27 }
  0x60   : > { %1256 = vmatpush3.bf16.msra.mxu0 %v1377_v1  ;;  %1259 = vmatprep.mubr.msk.bf16.mxu0 %vm1540_vm2, %v1538_v0 }
  0x61   : > { %1236 = vmatmul.mubr.msk.bf16.vlgmr.msra.gmra.mxu1 %vm294_vm7, %v525_v62  ;;  %1257 = vmatprep.subr.bf16.mxu0 %v1538_v0 }
  0x62   : > { %1248 = vmatpush3.bf16.msra.mxu1 %v1375_v63  ;;  %1251 = vmatprep.mubr.msk.bf16.mxu1 %vm1540_vm2, %v1538_v0 }
  0x63   : > { %1249 = vmatprep.subr.bf16.mxu1 %v1538_v0 }
  0x64   : > { %1258 = vmatpush3.bf16.msra.mxu0 %v1379_v10 }
  0x65   : > { %1271 = vmatprep.subr.bf16.mxu0 %v1538_v0 }
  0x66   : > { %1250 = vmatpush3.bf16.msra.mxu1 %v1378_v9 }
  0x67   : > { %1263 = vmatprep.subr.bf16.mxu1 %v1538_v0  ;;  %1260 = vmatmul.mubr.msk.bf16.vlgmr.msra.gmra.mxu0 %vm294_vm7, %v752_v15 }
  0x68   : > { %1272 = vmatpush3.bf16.msra.mxu0 %v1383_v20  ;;  %1275 = vmatprep.mubr.msk.bf16.mxu0 %vm1540_vm2, %v1538_v0 }
  0x69   : > { %1252 = vmatmul.mubr.msk.bf16.vlgmr.msra.gmra.mxu1 %vm294_vm7, %v681_v17  ;;  %1273 = vmatprep.subr.bf16.mxu0 %v1538_v0 }
  0x6a   : > { %1264 = vmatpush3.bf16.msra.mxu1 %v1381_v19  ;;  %1267 = vmatprep.mubr.msk.bf16.mxu1 %vm1540_vm2, %v1538_v0 }
  0x6b   : > { %1265 = vmatprep.subr.bf16.mxu1 %v1538_v0  ;;  %v1135_v0 = vld [vmem:[%s1833_s2] ss:$0 sm:$0xff] }
  0x6c   : > { %1274 = vmatpush3.bf16.msra.mxu0 %v1385_v25 }
  0x6e   : > { %1266 = vmatpush3.bf16.msra.mxu1 %v1384_v24 }
  0x6f   : > { %1276 = vmatmul.mubr.msk.bf16.vlgmr.msra.gmra.mxu0 %vm294_vm7, %v1169_v28 }
  0x71   : > { %1268 = vmatmul.mubr.msk.bf16.vlgmr.msra.gmra.mxu1 %vm294_vm7, %v837_v29 }
 0x10f   : > { %v332_v30 = vpop.f32.mrf.mxu0 }
 0x110   : > { %v339_v39 = vadd.f32 %v1135_v0, %v332_v30 }
 0x111   : > { %v1213_v31 = vpop.f32.mrf.mxu0 }
 0x113   : > { %v335_v32 = vpop.f32.mrf.mxu0 }
 0x114   : > { %v340_v45 = vadd.f32 %v1135_v0, %v335_v32 }
 0x115   : > { %v1214_v33 = vpop.f32.mrf.mxu0 }
 0x117   : > { %v490_v35 = vpop.f32.mrf.mxu0 }
 0x119   : > { %v419_v34 = vpop.f32.mrf.mxu1  ;;  %v1229_v37 = vpop.f32.mrf.mxu0 }
 0x11a   : > { %v426_v42 = vadd.f32 %v419_v34, %v339_v39 }
 0x11b   : > { %v1221_v36 = vpop.f32.mrf.mxu1  ;;  %v493_v38 = vpop.f32.mrf.mxu0 }
 0x11c   : > { %v497_v48 = vadd.f32 %v490_v35, %v426_v42 }
 0x11d   : > { %v422_v18 = vpop.f32.mrf.mxu1  ;;  %v1230_v41 = vpop.f32.mrf.mxu0 }
 0x11e   : > { %v427_v49 = vadd.f32 %v422_v18, %v340_v45 }
 0x11f   : > { %v1222_v40 = vpop.f32.mrf.mxu1  ;;  %v646_v44 = vpop.f32.mrf.mxu0 }
 0x120   : > { %v498_v55 = vadd.f32 %v493_v38, %v427_v49 }
 0x121   : > { %v575_v43 = vpop.f32.mrf.mxu1  ;;  %v1245_v47 = vpop.f32.mrf.mxu0 }
 0x122   : > { %v582_v52 = vadd.f32 %v575_v43, %v497_v48 }
 0x123   : > { %v1237_v46 = vpop.f32.mrf.mxu1  ;;  %v649_v51 = vpop.f32.mrf.mxu0 }
 0x124   : > { %v653_v58 = vadd.f32 %v646_v44, %v582_v52 }
 0x125   : > { %v578_v50 = vpop.f32.mrf.mxu1  ;;  %v1246_v54 = vpop.f32.mrf.mxu0 }
 0x126   : > { %v583_v59 = vadd.f32 %v578_v50, %v498_v55 }
 0x127   : > { %v1238_v53 = vpop.f32.mrf.mxu1  ;;  %v802_v57 = vpop.f32.mrf.mxu0 }
 0x128   : > { %v654_v2 = vadd.f32 %v649_v51, %v583_v59 }
 0x129   : > { %v731_v56 = vpop.f32.mrf.mxu1  ;;  %v1261_v61 = vpop.f32.mrf.mxu0 }
 0x12a   : > { %v738_v62 = vadd.f32 %v731_v56, %v653_v58 }
 0x12b   : > { %v1253_v60 = vpop.f32.mrf.mxu1  ;;  %v805_v1 = vpop.f32.mrf.mxu0 }
 0x12c   : > { %v809_v5 = vadd.f32 %v802_v57, %v738_v62 }
 0x12d   : > { %v734_v63 = vpop.f32.mrf.mxu1  ;;  %v1262_v4 = vpop.f32.mrf.mxu0 }
 0x12e   : > { %v739_v6 = vadd.f32 %v734_v63, %v654_v2 }
 0x12f   : > { %v1254_v3 = vpop.f32.mrf.mxu1  ;;  %v951_v8 = vpop.f32.mrf.mxu0 }
 0x130   : > { %v810_v12 = vadd.f32 %v805_v1, %v739_v6 }
 0x131   : > { %v887_v7 = vpop.f32.mrf.mxu1  ;;  %v1277_v11 = vpop.f32.mrf.mxu0 }
 0x132   : > { %v894_v9 = vadd.f32 %v887_v7, %v809_v5 }
 0x133   : > { %v1269_v10 = vpop.f32.mrf.mxu1  ;;  %v954_v14 = vpop.f32.mrf.mxu0 }
 0x134   : > { %v958_v15 = vadd.f32 %v951_v8, %v894_v9 }
 0x135   : > { %v890_v13 = vpop.f32.mrf.mxu1  ;;  %v1278_v19 = vpop.f32.mrf.mxu0 }
 0x136   : > { %v895_v16 = vadd.f32 %v890_v13, %v810_v12  ;;  %v961_v21 = vsel %vm960_vm15, %v958_v15, -inf }
 0x137   : > { %v1270_v17 = vpop.f32.mrf.mxu1 }
 0x138   : > { %v959_v20 = vadd.f32 %v954_v14, %v895_v16 }
 0x13a   : > { %v962_v22 = vsel %vm960_vm15, %v959_v20, -inf }
 0x13b   : > { %v963_v23 = vmax.f32 %v961_v21, %v962_v22 }
 0x13d   : > { %v964_v24 = vrot.slane %v963_v23, 4 }
 0x13f   : > { %v965_v25 = vmax.f32 %v963_v23, %v964_v24 }
 0x141   : > { %v966_v26 = vrot.slane %v965_v25, 2 }
 0x143   : > { %v967_v27 = vmax.f32 %v965_v25, %v966_v26 }
 0x145   : > { %v968_v28 = vrot.slane %v967_v27, 1 }
 0x147   : > { %v969_v29 = vmax.f32 %v967_v27, %v968_v28 }
 0x149   : > { %v970_v30 = vsub.f32 %v958_v15, %v969_v29  ;;  %v971_v31 = vsub.f32 %v959_v20, %v969_v29 }
 0x14b   : > { %v972_v32 = vmul.f32 1.442695, %v970_v30  ;;  %v974_v33 = vmul.f32 1.442695, %v971_v31 }
 0x14d   : > { %1388 = vpow2.f32 %v972_v32 }
 0x14e   : > { %1390 = vpow2.f32 %v974_v33 }
 0x15a   : > { %v1389_v34 = vpop.eup %1388 }
 0x15b   : > { %v1391_v35 = vpop.eup %1390  ;;  %v976_v0 = vsel %vm960_vm15, %v1389_v34, 0.0 }
 0x15c   : > { %v977_v36 = vsel %vm960_vm15, %v1391_v35, 0.0 }
 0x15d   : > { %v978_v37 = vadd.f32 %v977_v36, %v976_v0 }
 0x15f   : > { %v979_v18 = vrot.slane %v978_v37, 4 }
 0x161   : > { %v980_v38 = vadd.f32 %v979_v18, %v978_v37 }
 0x163   : > { %v981_v39 = vrot.slane %v980_v38, 2 }
 0x165   : > { %v982_v40 = vadd.f32 %v981_v39, %v980_v38 }
 0x167   : > { %v983_v41 = vrot.slane %v982_v40, 1 }
 0x169   : > { %v984_v42 = vadd.f32 %v983_v41, %v982_v40 }
 0x16b   : > { %1392 = vrcp.f32 %v984_v42 }
 0x178   : > { %v1393_v43 = vpop.eup %1392 }
 0x179   : > { %v986_v44 = vmul.f32 %v1393_v43, %v1389_v34  ;;  %v987_v45 = vmul.f32 %v1393_v43, %v1391_v35 }
 0x17b   : > { %990 = vrot.lane.b32.xlu0 %v986_v44, %s1541_s24 }
 0x17f   : > { %992 = vrot.lane.b32.xlu0 %v987_v45, %s1541_s24 }
 0x1ed   : > { %v991_v46 = vpop.permute.xlu0 %990 }
 0x1ee   : > { %v996_v47 = vmul.f32 %v991_v46, %v958_v15 }
 0x1f0   : > { %998 = vst.msk [vmem:[%s236_s29] sm:$0xff] %vm294_vm7, %v996_v47 }
 0x1f1   : > { %v993_v48 = vpop.permute.xlu0 %992 }
 0x1f2   : > { %v997_v49 = vmul.f32 %v993_v48, %v959_v20 }
 0x1f4   : > { %999 = vst.msk [vmem:[%s236_s29 + $0x8] sm:$0xff] %vm294_vm7, %v997_v49 }
 0x1f5   : > { %1461 = shalt.err (!%p1458_p5)
}
 0x1f6   : > { %s1462_s26 = scalar_lea.hbm %s1782_s7, 256  ;;  %s1466_s22 = scalar_lea.hbm %s1834_s3, 512 }
 0x1f7   : > { %p1463_p7 = scmp.ne.s32.totalorder %s1782_s7, %s1462_s26  ;;  %p1467_p9 = scmp.lt.s32.totalorder %s1782_s7, %s1834_s3 }
 0x1f8   : > { %p1468_p11 = scmp.lt.s32.totalorder %s1466_s22, %s1462_s26 }
 0x1f9   : > { %p1464_p4 = pnand %p1463_p7, %p1655_p13 }
 0x1fa   : > { %p1469_p12 = por %p1468_p11, %p1467_p9 }
 0x1fb   : > { %p1465_p6 = pneg %p1464_p4 }
 0x1fd   : > { %p1470_p1 = pnand %p1469_p12, %p1465_p6 }
 0x1ff   : > { %1473 = shalt.err (!%p1470_p1)
}
 0x200   : > { %s1543_s29 = smov 128   ;;  %s1544_s6 = smov 8  }
 0x201   : > { %1285 = dma.vmem_to_hbm [thread:$0]  (%p1655_p13), %s1776_s5, 256, %s1782_s7, %s1001_s25, %s1543_s29, %s1543_s29, %s1544_s6  }
 0x202 PF: > { %s1030_s21 = sand.u32 1, %s1512_s12   ;;  %p1850_p8 = scmp.ne.s32.totalorder %s1841_s23, 0 }
 0x203   : > { %p1851_p10 = scmp.ge.s32.totalorder %s1532_s17, 2  ;;  %s1031_s10 = scalar_lea.sflag [#allocation5], %s1030_s21 }
 0x205   : > { %p1296_p0 = pnand %p1851_p10, %p1850_p8 }
 0x207   : > { %p1297_p2 = pneg %p1296_p0 }
 0x209   : > { %1507 = dma.done.wait (%p1297_p2), %s1031_s10, 256  }
 0x20a   : > { %1509 = vsyncadd (%p1297_p2), %s1031_s10, 4294967040  ;;  %s20_s17 = sadd.s32 1, %s1532_s17   ;;  %s1852_s12 = smov %s1516_s13 }
 0x20b   : > { %p17_p3 = scmp.ge.s32.totalorder %s20_s17, 4   ;;  %s1853_s13 = smov %s1520_s14 }
 0x20c   : > { %s1854_s14 = smov %s1664_s19  ;;  %s1855_s15 = smov %s1528_s16 }
 0x20d   : > { %s1856_s16 = smov %s1858_s28  ;;  %19 = sbr.rel (!%p17_p3) target bundleno = 7 (0x7), region = 93 }
 0x212   :  { %1036 = vsyncpa [#allocation4], 1 }
 0x213   :  { %1038 = vsyncpa [#allocation4 + $0x1], 1 }
 0x214   :  { %1039 = vsyncpa [#allocation7], 1 }
 0x215   :  { %1040 = vsyncpa [#allocation5], 1 }
 0x216   :  { %1042 = vsyncpa [#allocation5 + $0x1], 1 }

</bundles_post_ra>
